<compile_context>
chip_gen: v7x
topology: tpu7x:2x2x1
jax: 0.10.0
libtpu: 0.0.40
codegen_flags: <defaults>
</compile_context>

<pallas_src>
import functools
import math

import jax
import jax.numpy as jnp
from jax.experimental import pallas as pl
from jax.experimental.pallas import tpu as pltpu

VMEM_LIMIT = 48 * 1024 * 1024  # fits v7x's 64 MiB as well as v5e/v6e's 128 MiB


def _round_up(x, m):
    return ((x + m - 1) // m) * m


def _pick_tile(dim, target, unit):
    """Largest divisor of `dim` that is a multiple of `unit` and <= target.
    Falls back to the full dim when it is small / not unit-aligned."""
    if dim <= unit or dim % unit != 0:
        return dim
    t = min(target, dim)
    t -= t % unit
    while dim % t != 0:
        t -= unit
    return t


def _gelu_f32(y):
    # tanh-approximate GELU (EUP tanh, always lowers on Mosaic).
    # TODO(synk): HF BERT "gelu" is the exact erf variant; max abs diff ~3e-4.
    c = 0.7978845608028654  # sqrt(2/pi)
    return 0.5 * y * (1.0 + jnp.tanh(c * (y + 0.044715 * y * y * y)))


# --------------------------------------------------------------------------
# Kernel 1: tiled dense  y = act(x @ w + b)
# --------------------------------------------------------------------------

def _dense_bias_act_kernel(x_ref, w_ref, b_ref, o_ref, acc_ref, *, activation):
    @pl.when(pl.program_id(2) == 0)
    def _():
        acc_ref[...] = jnp.zeros_like(acc_ref)

    acc_ref[...] += jnp.dot(x_ref[...], w_ref[...],
                            preferred_element_type=jnp.float32)

    @pl.when(pl.program_id(2) == pl.num_programs(2) - 1)
    def _():
        y = acc_ref[...] + b_ref[...]
        if activation == "gelu":
            y = _gelu_f32(y)
        elif activation == "tanh":
            y = jnp.tanh(y)
        o_ref[...] = y.astype(o_ref.dtype)


def dense(x, w, b, activation="none", out_dtype=jnp.bfloat16):
    """x: (M,K) bf16, w: (K,N) bf16, b: (1,N) f32 -> (M,N) out_dtype."""
    M, K = x.shape
    N = w.shape[1]
    tm = _pick_tile(M, 256, 8)
    tk = _pick_tile(K, 512, 128)
    tn = _pick_tile(N, 512, 128)
    grid = (M // tm, N // tn, K // tk)
    return pl.pallas_call(
        functools.partial(_dense_bias_act_kernel, activation=activation),
        grid=grid,
        in_specs=[pl.BlockSpec((tm, tk), lambda i, j, k: (i, k)),
                  pl.BlockSpec((tk, tn), lambda i, j, k: (k, j)),
                  pl.BlockSpec((1, tn), lambda i, j, k: (0, j))],
        out_specs=pl.BlockSpec((tm, tn), lambda i, j, k: (i, j)),
        out_shape=jax.ShapeDtypeStruct((M, N), out_dtype),
        scratch_shapes=[pltpu.VMEM((tm, tn), jnp.float32)],
        compiler_params=pltpu.CompilerParams(
            dimension_semantics=("parallel", "parallel", "arbitrary"),
            vmem_limit_bytes=VMEM_LIMIT),
    )(x, w, b)


# --------------------------------------------------------------------------
# Kernel 2: tiled dense fused with bias + residual + LayerNorm epilogue
#   o = LayerNorm(x @ w + b + residual) * gamma + beta
# --------------------------------------------------------------------------

def _dense_res_ln_kernel(x_ref, w_ref, b_ref, r_ref, g_ref, bb_ref,
                         o_ref, acc_ref, *, eps):
    @pl.when(pl.program_id(1) == 0)
    def _():
        acc_ref[...] = jnp.zeros_like(acc_ref)

    acc_ref[...] += jnp.dot(x_ref[...], w_ref[...],
                            preferred_element_type=jnp.float32)

    @pl.when(pl.program_id(1) == pl.num_programs(1) - 1)
    def _():
        h = acc_ref[...] + b_ref[...] + r_ref[...].astype(jnp.float32)
        mean = jnp.mean(h, axis=-1, keepdims=True)
        cen = h - mean
        var = jnp.mean(cen * cen, axis=-1, keepdims=True)
        y = cen * jax.lax.rsqrt(var + eps) * g_ref[...] + bb_ref[...]
        o_ref[...] = y.astype(o_ref.dtype)


def dense_residual_ln(x, w, b, residual, gamma, beta, eps=1e-12,
                      out_dtype=jnp.bfloat16):
    """x:(M,K) bf16, w:(K,H) bf16, b/gamma/beta:(1,H) f32, residual:(M,H) bf16."""
    M, K = x.shape
    H = w.shape[1]
    tm = _pick_tile(M, 256, 8)
    tk = _pick_tile(K, 512, 128)
    grid = (M // tm, K // tk)
    return pl.pallas_call(
        functools.partial(_dense_res_ln_kernel, eps=eps),
        grid=grid,
        in_specs=[pl.BlockSpec((tm, tk), lambda i, k: (i, k)),
                  pl.BlockSpec((tk, H), lambda i, k: (k, 0)),
                  pl.BlockSpec((1, H), lambda i, k: (0, 0)),
                  pl.BlockSpec((tm, H), lambda i, k: (i, 0)),
                  pl.BlockSpec((1, H), lambda i, k: (0, 0)),
                  pl.BlockSpec((1, H), lambda i, k: (0, 0))],
        out_specs=pl.BlockSpec((tm, H), lambda i, k: (i, 0)),
        out_shape=jax.ShapeDtypeStruct((M, H), out_dtype),
        scratch_shapes=[pltpu.VMEM((tm, H), jnp.float32)],
        compiler_params=pltpu.CompilerParams(
            dimension_semantics=("parallel", "arbitrary"),
            vmem_limit_bytes=VMEM_LIMIT),
    )(x, w, b, residual, gamma, beta)


# --------------------------------------------------------------------------
# Kernel 3: row-tiled add + LayerNorm (embedding sum only)
# --------------------------------------------------------------------------

def _add_ln_kernel(x_ref, r_ref, g_ref, b_ref, o_ref, *, eps):
    h = x_ref[...].astype(jnp.float32) + r_ref[...].astype(jnp.float32)
    mean = jnp.mean(h, axis=-1, keepdims=True)
    cen = h - mean
    var = jnp.mean(cen * cen, axis=-1, keepdims=True)
    y = cen * jax.lax.rsqrt(var + eps) * g_ref[...] + b_ref[...]
    o_ref[...] = y.astype(o_ref.dtype)


def add_layernorm(x, r, gamma, beta, eps=1e-12, out_dtype=jnp.bfloat16):
    M, H = x.shape
    tm = _pick_tile(M, 256, 8)
    grid = (M // tm,)
    return pl.pallas_call(
        functools.partial(_add_ln_kernel, eps=eps),
        grid=grid,
        in_specs=[pl.BlockSpec((tm, H), lambda i: (i, 0)),
                  pl.BlockSpec((tm, H), lambda i: (i, 0)),
                  pl.BlockSpec((1, H), lambda i: (0, 0)),
                  pl.BlockSpec((1, H), lambda i: (0, 0))],
        out_specs=pl.BlockSpec((tm, H), lambda i: (i, 0)),
        out_shape=jax.ShapeDtypeStruct((M, H), out_dtype),
        compiler_params=pltpu.CompilerParams(
            dimension_semantics=("parallel",),
            vmem_limit_bytes=VMEM_LIMIT),
    )(x, r, gamma, beta)


# --------------------------------------------------------------------------
# Kernel 4: multi-head self-attention straight from the fused QKV buffer
#   qkv: (B*S, 3H), columns [0,H)=Q, [H,2H)=K, [2H,3H)=V, head h -> h*Dh..
#   output: (B*S, H) lane-dense context (no (B,nH,S,Dh) transposes)
# --------------------------------------------------------------------------

def _attn_kernel(q_ref, k_ref, v_ref, m_ref, o_ref, *, heads_per_blk,
                 head_dim, scale):
    mask = m_ref[0]                      # (1, S) additive mask, f32
    q_all = q_ref[...]                   # (S, heads_per_blk*Dh) bf16
    k_all = k_ref[...]
    v_all = v_ref[...]
    outs = []
    for hh in range(heads_per_blk):      # static unrolled per-head loop
        lo, hi = hh * head_dim, (hh + 1) * head_dim
        q = q_all[:, lo:hi]
        k = k_all[:, lo:hi]
        v = v_all[:, lo:hi]
        s = jax.lax.dot_general(q, k, (((1,), (1,)), ((), ())),
                                preferred_element_type=jnp.float32)
        s = s * scale + mask             # broadcast over query rows
        s = s - jnp.max(s, axis=-1, keepdims=True)
        p = jnp.exp(s)
        p = p * pl.reciprocal(jnp.sum(p, axis=-1, keepdims=True), approx=True)
        outs.append(jnp.dot(p.astype(v.dtype), v,
                            preferred_element_type=jnp.float32))
    ctx = outs[0] if len(outs) == 1 else jnp.concatenate(outs, axis=-1)
    o_ref[...] = ctx.astype(o_ref.dtype)


def attention(qkv, mask_add, B, S, n_heads, head_dim):
    H = n_heads * head_dim
    heads_per_blk = max(1, 128 // head_dim)     # pack heads to 128-lane blocks
    heads_per_blk = min(heads_per_blk, n_heads)
    if n_heads % heads_per_blk != 0:
        heads_per_blk = 1
    n_grp = n_heads // heads_per_blk
    blk = heads_per_blk * head_dim

    q_spec = pl.BlockSpec((S, blk), lambda b, g: (b, g))
    k_spec = pl.BlockSpec((S, blk), lambda b, g: (b, n_grp + g))
    v_spec = pl.BlockSpec((S, blk), lambda b, g: (b, 2 * n_grp + g))
    m_spec = pl.BlockSpec((1, 1, S), lambda b, g: (b, 0, 0))
    o_spec = pl.BlockSpec((S, blk), lambda b, g: (b, g))

    return pl.pallas_call(
        functools.partial(_attn_kernel, heads_per_blk=heads_per_blk,
                          head_dim=head_dim, scale=1.0 / math.sqrt(head_dim)),
        grid=(B, n_grp),
        in_specs=[q_spec, k_spec, v_spec, m_spec],
        out_specs=o_spec,
        out_shape=jax.ShapeDtypeStruct((B * S, H), jnp.bfloat16),
        compiler_params=pltpu.CompilerParams(
            dimension_semantics=("parallel", "parallel"),
            vmem_limit_bytes=VMEM_LIMIT),
    )(qkv, qkv, qkv, mask_add)
    # TODO(synk): for S >= 1k switch to a KV-tiled flash-style loop (S^2 VMEM).


# --------------------------------------------------------------------------
# Kernel 5: fused pooler (tanh) + classifier (padded to 128 output lanes)
# --------------------------------------------------------------------------

def _pool_cls_kernel(x_ref, pw_ref, pb_ref, cw_ref, cb_ref, o_ref):
    pooled = jnp.tanh(jnp.dot(x_ref[...], pw_ref[...],
                              preferred_element_type=jnp.float32) + pb_ref[...])
    logits = jnp.dot(pooled.astype(cw_ref.dtype), cw_ref[...],
                     preferred_element_type=jnp.float32) + cb_ref[...]
    o_ref[...] = logits


def pool_and_classify(x_cls, pool_w, pool_b, cls_w, cls_b):
    B = x_cls.shape[0]
    ncp = cls_w.shape[1]
    return pl.pallas_call(
        _pool_cls_kernel,
        out_shape=jax.ShapeDtypeStruct((B, ncp), jnp.float32),
        compiler_params=pltpu.CompilerParams(vmem_limit_bytes=VMEM_LIMIT),
    )(x_cls, pool_w, pool_b, cls_w, cls_b)


# --------------------------------------------------------------------------
# Model definition (small-shape stand-in for bert-base-multilingual-uncased)
# --------------------------------------------------------------------------

CFG = dict(
    vocab=200,
    hidden=128,
    n_layers=2,
    n_heads=2,
    head_dim=64,
    intermediate=256,
    max_pos=16,
    type_vocab=2,
    num_classes=20,
)


def init_params(key, cfg):
    keys = iter(jax.random.split(key, 64))
    nrm = lambda shape: 0.02 * jax.random.normal(next(keys), shape, jnp.float32)
    H, I = cfg["hidden"], cfg["intermediate"]
    p = {
        "word_emb": nrm((cfg["vocab"], H)),
        "pos_emb": nrm((cfg["max_pos"], H)),
        "type_emb": nrm((cfg["type_vocab"], H)),
        "emb_ln_g": jnp.ones((H,), jnp.float32),
        "emb_ln_b": jnp.zeros((H,), jnp.float32),
        "pool_w": nrm((H, H)),
        "pool_b": jnp.zeros((H,), jnp.float32),
        "cls_w": nrm((H, cfg["num_classes"])),
        "cls_b": jnp.zeros((cfg["num_classes"],), jnp.float32),
        "layers": [],
    }
    for _ in range(cfg["n_layers"]):
        p["layers"].append({
            "wq": nrm((H, H)), "bq": jnp.zeros((H,), jnp.float32),
            "wk": nrm((H, H)), "bk": jnp.zeros((H,), jnp.float32),
            "wv": nrm((H, H)), "bv": jnp.zeros((H,), jnp.float32),
            "wo": nrm((H, H)), "bo": jnp.zeros((H,), jnp.float32),
            "ln1_g": jnp.ones((H,), jnp.float32),
            "ln1_b": jnp.zeros((H,), jnp.float32),
            "wi": nrm((H, I)), "bi": jnp.zeros((I,), jnp.float32),
            "wo2": nrm((I, H)), "bo2": jnp.zeros((H,), jnp.float32),
            "ln2_g": jnp.ones((H,), jnp.float32),
            "ln2_b": jnp.zeros((H,), jnp.float32),
        })
    return p


def prepare_params(raw, cfg):
    """Cast matmul weights to bf16, fuse QKV, reshape biases/LN params to
    (1, N) rows, pad classifier to a 128-lane output."""
    H = cfg["hidden"]
    NC = cfg["num_classes"]
    nc_pad = _round_up(NC, 128)
    bf = lambda a: a.astype(jnp.bfloat16)
    row = lambda a: a.reshape(1, -1).astype(jnp.float32)

    cls_w = jnp.zeros((H, nc_pad), jnp.float32).at[:, :NC].set(raw["cls_w"])
    cls_b = jnp.zeros((nc_pad,), jnp.float32).at[:NC].set(raw["cls_b"])

    p = {
        "word_emb": raw["word_emb"],
        "pos_emb": raw["pos_emb"],
        "type_emb": raw["type_emb"],
        "emb_ln_g": row(raw["emb_ln_g"]),
        "emb_ln_b": row(raw["emb_ln_b"]),
        "pool_w": bf(raw["pool_w"]),
        "pool_b": row(raw["pool_b"]),
        "cls_w": bf(cls_w),
        "cls_b": row(cls_b),
        "layers": [],
    }
    for lp in raw["layers"]:
        p["layers"].append({
            "wqkv": bf(jnp.concatenate([lp["wq"], lp["wk"], lp["wv"]], axis=1)),
            "bqkv": row(jnp.concatenate([lp["bq"], lp["bk"], lp["bv"]], axis=0)),
            "wo": bf(lp["wo"]), "bo": row(lp["bo"]),
            "ln1_g": row(lp["ln1_g"]), "ln1_b": row(lp["ln1_b"]),
            "wi": bf(lp["wi"]), "bi": row(lp["bi"]),
            "wo2": bf(lp["wo2"]), "bo2": row(lp["bo2"]),
            "ln2_g": row(lp["ln2_g"]), "ln2_b": row(lp["ln2_b"]),
        })
    return p


def mbert_base_d_forward(params, ids, attention_mask, token_type_ids, cfg):
    B, S = ids.shape
    H, nH, Dh = cfg["hidden"], cfg["n_heads"], cfg["head_dim"]

    # ---- embeddings (gathers are plain-JAX glue; add+layernorm in kernel) ----
    positions = jnp.arange(S, dtype=jnp.int32)
    word = jnp.take(params["word_emb"], ids, axis=0).reshape(B * S, H)
    pos = jnp.take(params["pos_emb"], positions, axis=0)
    pos = jnp.broadcast_to(pos[None], (B, S, H)).reshape(B * S, H)
    typ = jnp.take(params["type_emb"], token_type_ids, axis=0).reshape(B * S, H)
    h = add_layernorm(word, pos + typ, params["emb_ln_g"], params["emb_ln_b"])

    # ---- extended additive attention mask: (B, 1, S) ----
    mask_add = ((1.0 - attention_mask.astype(jnp.float32)) * -10000.0
                ).reshape(B, 1, S)

    # ---- encoder layers ----
    for lp in params["layers"]:
        qkv = dense(h, lp["wqkv"], lp["bqkv"])                    # (B*S, 3H) bf16
        ctx = attention(qkv, mask_add, B, S, nH, Dh)              # (B*S, H) bf16
        h = dense_residual_ln(ctx, lp["wo"], lp["bo"], h,
                              lp["ln1_g"], lp["ln1_b"])           # attn-out + LN1
        ffn = dense(h, lp["wi"], lp["bi"], activation="gelu")     # (B*S, I) bf16
        h = dense_residual_ln(ffn, lp["wo2"], lp["bo2"], h,
                              lp["ln2_g"], lp["ln2_b"])           # FFN-down + LN2

    # ---- pooler: tanh(W * h[:, 0] + b), then Dropout(0.6) -> Linear ----
    # TODO(synk): training-mode dropout (p=0.6) not implemented; eval-mode identity.
    h_cls = h.reshape(B, S, H)[:, 0, :]                           # (B, H) bf16
    logits_pad = pool_and_classify(h_cls, params["pool_w"], params["pool_b"],
                                   params["cls_w"], params["cls_b"])
    return logits_pad[:, :cfg["num_classes"]]


# --------------------------------------------------------------------------
# Demo
# --------------------------------------------------------------------------

if __name__ == "__main__":
    key = jax.random.PRNGKey(0)
    k_ids, k_params = jax.random.split(key)

    B, S = 2, 8
    ids = jax.random.randint(k_ids, (B, S), 0, CFG["vocab"], dtype=jnp.int32)
    attention_mask = jnp.ones((B, S), dtype=jnp.int32)
    token_type_ids = jnp.zeros((B, S), dtype=jnp.int32)

    raw_params = init_params(k_params, CFG)
    params = prepare_params(raw_params, CFG)

    fwd = jax.jit(functools.partial(mbert_base_d_forward, cfg=CFG))
    logits = fwd(params, ids, attention_mask, token_type_ids)
    jax.block_until_ready(logits)
    assert logits.shape == (B, CFG["num_classes"])
    assert bool(jnp.all(jnp.isfinite(logits)))
    print("KERNEL_OK")
</pallas_src>

<mosaic_0001>
module attributes {stable_mosaic.version = 11 : i64} {
  func.func @_add_ln_kernel(%arg0: i32, %arg1: memref<16x128xf32, #tpu.memory_space<vmem>>, %arg2: memref<16x128xf32, #tpu.memory_space<vmem>>, %arg3: memref<1x128xf32, #tpu.memory_space<vmem>>, %arg4: memref<1x128xf32, #tpu.memory_space<vmem>>, %arg5: memref<16x128xbf16, #tpu.memory_space<vmem>>) attributes {dimension_semantics = [#tpu.dimension_semantics<parallel>], iteration_bounds = array<i64: 1>, scalar_prefetch = 0 : i64, scratch_operands = 0 : i64, tpu.core_type = #tpu.core_type<tc>, window_params = [{transform_indices = @transform_0, window_bounds = array<i64: 16, 128>}, {transform_indices = @transform_1, window_bounds = array<i64: 16, 128>}, {pipeline_mode = #tpu.pipeline_mode<synchronous>, transform_indices = @transform_2, window_bounds = array<i64: 1, 128>}, {pipeline_mode = #tpu.pipeline_mode<synchronous>, transform_indices = @transform_3, window_bounds = array<i64: 1, 128>}, {transform_indices = @transform_4, window_bounds = array<i64: 16, 128>}]} {
    %c0 = arith.constant 0 : index
    %c0_0 = arith.constant 0 : index
    %0 = vector.load %arg1[%c0, %c0_0] : memref<16x128xf32, #tpu.memory_space<vmem>>, vector<16x128xf32>
    %c0_1 = arith.constant 0 : index
    %c0_2 = arith.constant 0 : index
    %1 = vector.load %arg2[%c0_1, %c0_2] : memref<16x128xf32, #tpu.memory_space<vmem>>, vector<16x128xf32>
    %2 = arith.addf %0, %1 : vector<16x128xf32>
    %cst = arith.constant dense<0.000000e+00> : vector<16xf32>
    %3 = vector.multi_reduction <add>, %2, %cst [1] : vector<16x128xf32> to vector<16xf32>
    %4 = vector.shape_cast %3 : vector<16xf32> to vector<16x1xf32>
    %cst_3 = arith.constant 1.280000e+02 : f32
    %5 = vector.broadcast %cst_3 : f32 to vector<16x1xf32>
    %6 = arith.divf %4, %5 : vector<16x1xf32>
    %7 = vector.broadcast %6 : vector<16x1xf32> to vector<16x128xf32>
    %8 = arith.subf %2, %7 : vector<16x128xf32>
    %9 = arith.mulf %8, %8 : vector<16x128xf32>
    %cst_4 = arith.constant dense<0.000000e+00> : vector<16xf32>
    %10 = vector.multi_reduction <add>, %9, %cst_4 [1] : vector<16x128xf32> to vector<16xf32>
    %11 = vector.shape_cast %10 : vector<16xf32> to vector<16x1xf32>
    %cst_5 = arith.constant 1.280000e+02 : f32
    %12 = vector.broadcast %cst_5 : f32 to vector<16x1xf32>
    %13 = arith.divf %11, %12 : vector<16x1xf32>
    %cst_6 = arith.constant 9.99999996E-13 : f32
    %14 = vector.broadcast %cst_6 : f32 to vector<16x1xf32>
    %15 = arith.addf %13, %14 : vector<16x1xf32>
    %16 = math.rsqrt %15 : vector<16x1xf32>
    %17 = vector.broadcast %16 : vector<16x1xf32> to vector<16x128xf32>
    %18 = arith.mulf %8, %17 : vector<16x128xf32>
    %c0_7 = arith.constant 0 : index
    %c0_8 = arith.constant 0 : index
    %19 = vector.load %arg3[%c0_7, %c0_8] : memref<1x128xf32, #tpu.memory_space<vmem>>, vector<1x128xf32>
    %20 = vector.broadcast %19 : vector<1x128xf32> to vector<16x128xf32>
    %21 = arith.mulf %18, %20 : vector<16x128xf32>
    %c0_9 = arith.constant 0 : index
    %c0_10 = arith.constant 0 : index
    %22 = vector.load %arg4[%c0_9, %c0_10] : memref<1x128xf32, #tpu.memory_space<vmem>>, vector<1x128xf32>
    %23 = vector.broadcast %22 : vector<1x128xf32> to vector<16x128xf32>
    %24 = arith.addf %21, %23 : vector<16x128xf32>
    %25 = arith.truncf %24 : vector<16x128xf32> to vector<16x128xbf16>
    %c0_11 = arith.constant 0 : index
    %c0_12 = arith.constant 0 : index
    %26 = vector.load %arg5[%c0_11, %c0_12] : memref<16x128xbf16, #tpu.memory_space<vmem>>, vector<16x128xbf16>
    tpu.vector_store %arg5[%c0_11, %c0_12], %25 {strides = array<i32>} : memref<16x128xbf16, #tpu.memory_space<vmem>>, vector<16x128xbf16>,
    return
  }
  func.func @transform_0(%arg0: i32) -> (i32, i32) {
    %c0_i32 = arith.constant 0 : i32
    %c0_i32_0 = arith.constant 0 : i32
    return %arg0, %c0_i32 : i32, i32
  }
  func.func @transform_1(%arg0: i32) -> (i32, i32) {
    %c0_i32 = arith.constant 0 : i32
    %c0_i32_0 = arith.constant 0 : i32
    return %arg0, %c0_i32 : i32, i32
  }
  func.func @transform_2(%arg0: i32) -> (i32, i32) {
    %c0_i32 = arith.constant 0 : i32
    %c0_i32_0 = arith.constant 0 : i32
    %c0_i32_1 = arith.constant 0 : i32
    return %c0_i32, %c0_i32_0 : i32, i32
  }
  func.func @transform_3(%arg0: i32) -> (i32, i32) {
    %c0_i32 = arith.constant 0 : i32
    %c0_i32_0 = arith.constant 0 : i32
    %c0_i32_1 = arith.constant 0 : i32
    return %c0_i32, %c0_i32_0 : i32, i32
  }
  func.func @transform_4(%arg0: i32) -> (i32, i32) {
    %c0_i32 = arith.constant 0 : i32
    %c0_i32_0 = arith.constant 0 : i32
    return %arg0, %c0_i32 : i32, i32
  }
}

module attributes {stable_mosaic.version = 11 : i64} {
  func.func @_dense_bias_act_kernel(%arg0: i32, %arg1: i32, %arg2: i32, %arg3: memref<16x128xbf16, #tpu.memory_space<vmem>>, %arg4: memref<128x384xbf16, #tpu.memory_space<vmem>>, %arg5: memref<1x384xf32, #tpu.memory_space<vmem>>, %arg6: memref<16x384xbf16, #tpu.memory_space<vmem>>, %arg7: memref<16x384xf32, #tpu.memory_space<vmem>>) attributes {dimension_semantics = [#tpu.dimension_semantics<parallel>, #tpu.dimension_semantics<parallel>, #tpu.dimension_semantics<arbitrary>], iteration_bounds = array<i64: 1, 1, 1>, scalar_prefetch = 0 : i64, scratch_operands = 1 : i64, tpu.core_type = #tpu.core_type<tc>, window_params = [{transform_indices = @transform_0, window_bounds = array<i64: 16, 128>}, {transform_indices = @transform_1, window_bounds = array<i64: 128, 384>}, {transform_indices = @transform_2, window_bounds = array<i64: 1, 384>}, {transform_indices = @transform_3, window_bounds = array<i64: 16, 384>}]} {
    %c0_i32 = arith.constant 0 : i32
    %0 = arith.cmpi eq, %arg2, %c0_i32 : i32
    %1 = arith.extui %0 : i1 to i32
    %c0_i32_0 = arith.constant 0 : i32
    %2 = arith.cmpi ne, %1, %c0_i32_0 : i32
    scf.if %2 {
      %cst_10 = arith.constant 0.000000e+00 : f32
      %12 = vector.broadcast %cst_10 : f32 to vector<16x384xf32>
      %c0_11 = arith.constant 0 : index
      %c0_12 = arith.constant 0 : index
      %13 = vector.load %arg7[%c0_11, %c0_12] : memref<16x384xf32, #tpu.memory_space<vmem>>, vector<16x384xf32>
      tpu.vector_store %arg7[%c0_11, %c0_12], %12 {strides = array<i32>} : memref<16x384xf32, #tpu.memory_space<vmem>>, vector<16x384xf32>,
    } else {
    }
    %c0 = arith.constant 0 : index
    %c0_1 = arith.constant 0 : index
    %3 = vector.load %arg7[%c0, %c0_1] : memref<16x384xf32, #tpu.memory_space<vmem>>, vector<16x384xf32>
    %c0_2 = arith.constant 0 : index
    %c0_3 = arith.constant 0 : index
    %4 = vector.load %arg3[%c0_2, %c0_3] : memref<16x128xbf16, #tpu.memory_space<vmem>>, vector<16x128xbf16>
    %c0_4 = arith.constant 0 : index
    %c0_5 = arith.constant 0 : index
    %5 = vector.load %arg4[%c0_4, %c0_5] : memref<128x384xbf16, #tpu.memory_space<vmem>>, vector<128x384xbf16>
    %cst = arith.constant dense<0.000000e+00> : vector<16x384xf32>
    %6 = tpu.matmul %4, %5, %cst {dimension_numbers = #tpu.dot_dimension_numbers<[1], [0], [0], [1], [0, 0, 1, 1], [], []>} : vector<16x128xbf16>, vector<128x384xbf16>, vector<16x384xf32> -> vector<16x384xf32>
    %7 = arith.addf %3, %6 : vector<16x384xf32>
    %c0_6 = arith.constant 0 : index
    %c0_7 = arith.constant 0 : index
    %8 = vector.load %arg7[%c0_6, %c0_7] : memref<16x384xf32, #tpu.memory_space<vmem>>, vector<16x384xf32>
    tpu.vector_store %arg7[%c0_6, %c0_7], %7 {strides = array<i32>} : memref<16x384xf32, #tpu.memory_space<vmem>>, vector<16x384xf32>,
    %c0_i32_8 = arith.constant 0 : i32
    %9 = arith.cmpi eq, %arg2, %c0_i32_8 : i32
    %10 = arith.extui %9 : i1 to i32
    %c0_i32_9 = arith.constant 0 : i32
    %11 = arith.cmpi ne, %10, %c0_i32_9 : i32
    scf.if %11 {
      %c0_10 = arith.constant 0 : index
      %c0_11 = arith.constant 0 : index
      %12 = vector.load %arg7[%c0_10, %c0_11] : memref<16x384xf32, #tpu.memory_space<vmem>>, vector<16x384xf32>
      %c0_12 = arith.constant 0 : index
      %c0_13 = arith.constant 0 : index
      %13 = vector.load %arg5[%c0_12, %c0_13] : memref<1x384xf32, #tpu.memory_space<vmem>>, vector<1x384xf32>
      %14 = vector.broadcast %13 : vector<1x384xf32> to vector<16x384xf32>
      %15 = arith.addf %12, %14 : vector<16x384xf32>
      %16 = arith.truncf %15 : vector<16x384xf32> to vector<16x384xbf16>
      %c0_14 = arith.constant 0 : index
      %c0_15 = arith.constant 0 : index
      %17 = vector.load %arg6[%c0_14, %c0_15] : memref<16x384xbf16, #tpu.memory_space<vmem>>, vector<16x384xbf16>
      tpu.vector_store %arg6[%c0_14, %c0_15], %16 {strides = array<i32>} : memref<16x384xbf16, #tpu.memory_space<vmem>>, vector<16x384xbf16>,
    } else {
    }
    return
  }
  func.func @transform_0(%arg0: i32, %arg1: i32, %arg2: i32) -> (i32, i32) {
    %c0_i32 = arith.constant 0 : i32
    return %arg0, %arg2 : i32, i32
  }
  func.func @transform_1(%arg0: i32, %arg1: i32, %arg2: i32) -> (i32, i32) {
    %c0_i32 = arith.constant 0 : i32
    return %arg2, %arg1 : i32, i32
  }
  func.func @transform_2(%arg0: i32, %arg1: i32, %arg2: i32) -> (i32, i32) {
    %c0_i32 = arith.constant 0 : i32
    %c0_i32_0 = arith.constant 0 : i32
    return %c0_i32, %arg1 : i32, i32
  }
  func.func @transform_3(%arg0: i32, %arg1: i32, %arg2: i32) -> (i32, i32) {
    %c0_i32 = arith.constant 0 : i32
    return %arg0, %arg1 : i32, i32
  }
}

module attributes {stable_mosaic.version = 11 : i64} {
  func.func @_attn_kernel(%arg0: i32, %arg1: i32, %arg2: memref<8x128xbf16, #tpu.memory_space<vmem>>, %arg3: memref<8x128xbf16, #tpu.memory_space<vmem>>, %arg4: memref<8x128xbf16, #tpu.memory_space<vmem>>, %arg5: memref<1x1x8xf32, #tpu.memory_space<vmem>>, %arg6: memref<8x128xbf16, #tpu.memory_space<vmem>>) attributes {dimension_semantics = [#tpu.dimension_semantics<parallel>, #tpu.dimension_semantics<parallel>], iteration_bounds = array<i64: 2, 1>, scalar_prefetch = 0 : i64, scratch_operands = 0 : i64, tpu.core_type = #tpu.core_type<tc>, window_params = [{transform_indices = @transform_0, window_bounds = array<i64: 8, 128>}, {transform_indices = @transform_1, window_bounds = array<i64: 8, 128>}, {transform_indices = @transform_2, window_bounds = array<i64: 8, 128>}, {transform_indices = @transform_3, window_bounds = array<i64: 1, 1, 8>}, {transform_indices = @transform_4, window_bounds = array<i64: 8, 128>}]} {
    %c0 = arith.constant 0 : index
    %c0_0 = arith.constant 0 : index
    %c0_1 = arith.constant 0 : index
    %0 = vector.load %arg5[%c0, %c0_0, %c0_1] : memref<1x1x8xf32, #tpu.memory_space<vmem>>, vector<1x1x8xf32>
    %1 = vector.shape_cast %0 : vector<1x1x8xf32> to vector<1x8xf32>
    %c0_2 = arith.constant 0 : index
    %c0_3 = arith.constant 0 : index
    %2 = vector.load %arg2[%c0_2, %c0_3] : memref<8x128xbf16, #tpu.memory_space<vmem>>, vector<8x128xbf16>
    %c0_4 = arith.constant 0 : index
    %c0_5 = arith.constant 0 : index
    %3 = vector.load %arg3[%c0_4, %c0_5] : memref<8x128xbf16, #tpu.memory_space<vmem>>, vector<8x128xbf16>
    %c0_6 = arith.constant 0 : index
    %c0_7 = arith.constant 0 : index
    %4 = vector.load %arg4[%c0_6, %c0_7] : memref<8x128xbf16, #tpu.memory_space<vmem>>, vector<8x128xbf16>
    %5 = vector.extract_strided_slice %2 {offsets = [0, 0], sizes = [8, 64], strides = [1, 1]} : vector<8x128xbf16> to vector<8x64xbf16>
    %6 = vector.extract_strided_slice %3 {offsets = [0, 0], sizes = [8, 64], strides = [1, 1]} : vector<8x128xbf16> to vector<8x64xbf16>
    %7 = vector.extract_strided_slice %4 {offsets = [0, 0], sizes = [8, 64], strides = [1, 1]} : vector<8x128xbf16> to vector<8x64xbf16>
    %cst = arith.constant dense<0.000000e+00> : vector<8x8xf32>
    %8 = tpu.matmul %5, %6, %cst {dimension_numbers = #tpu.dot_dimension_numbers<[1], [1], [0], [0], [0, 0, 1, 0], [], []>} : vector<8x64xbf16>, vector<8x64xbf16>, vector<8x8xf32> -> vector<8x8xf32>
    %cst_8 = arith.constant 1.250000e-01 : f32
    %9 = vector.broadcast %cst_8 : f32 to vector<8x8xf32>
    %10 = arith.mulf %8, %9 : vector<8x8xf32>
    %11 = vector.broadcast %1 : vector<1x8xf32> to vector<8x8xf32>
    %12 = arith.addf %10, %11 : vector<8x8xf32>
    %cst_9 = arith.constant dense<0xFF800000> : vector<8xf32>
    %13 = vector.multi_reduction <maximumf>, %12, %cst_9 [1] : vector<8x8xf32> to vector<8xf32>
    %14 = vector.shape_cast %13 : vector<8xf32> to vector<8x1xf32>
    %15 = vector.broadcast %14 : vector<8x1xf32> to vector<8x8xf32>
    %16 = arith.subf %12, %15 : vector<8x8xf32>
    %17 = math.exp %16 : vector<8x8xf32>
    %cst_10 = arith.constant dense<0.000000e+00> : vector<8xf32>
    %18 = vector.multi_reduction <add>, %17, %cst_10 [1] : vector<8x8xf32> to vector<8xf32>
    %19 = vector.shape_cast %18 : vector<8xf32> to vector<8x1xf32>
    %20 = tpu.reciprocal %19 {approx = true} : vector<8x1xf32> -> vector<8x1xf32>
    %21 = vector.broadcast %20 : vector<8x1xf32> to vector<8x8xf32>
    %22 = arith.mulf %17, %21 : vector<8x8xf32>
    %23 = arith.truncf %22 : vector<8x8xf32> to vector<8x8xbf16>
    %cst_11 = arith.constant dense<0.000000e+00> : vector<8x64xf32>
    %24 = tpu.matmul %23, %7, %cst_11 {dimension_numbers = #tpu.dot_dimension_numbers<[1], [0], [0], [1], [0, 0, 1, 1], [], []>} : vector<8x8xbf16>, vector<8x64xbf16>, vector<8x64xf32> -> vector<8x64xf32>
    %25 = vector.extract_strided_slice %2 {offsets = [0, 64], sizes = [8, 64], strides = [1, 1]} : vector<8x128xbf16> to vector<8x64xbf16>
    %26 = vector.extract_strided_slice %3 {offsets = [0, 64], sizes = [8, 64], strides = [1, 1]} : vector<8x128xbf16> to vector<8x64xbf16>
    %27 = vector.extract_strided_slice %4 {offsets = [0, 64], sizes = [8, 64], strides = [1, 1]} : vector<8x128xbf16> to vector<8x64xbf16>
    %cst_12 = arith.constant dense<0.000000e+00> : vector<8x8xf32>
    %28 = tpu.matmul %25, %26, %cst_12 {dimension_numbers = #tpu.dot_dimension_numbers<[1], [1], [0], [0], [0, 0, 1, 0], [], []>} : vector<8x64xbf16>, vector<8x64xbf16>, vector<8x8xf32> -> vector<8x8xf32>
    %cst_13 = arith.constant 1.250000e-01 : f32
    %29 = vector.broadcast %cst_13 : f32 to vector<8x8xf32>
    %30 = arith.mulf %28, %29 : vector<8x8xf32>
    %31 = vector.broadcast %1 : vector<1x8xf32> to vector<8x8xf32>
    %32 = arith.addf %30, %31 : vector<8x8xf32>
    %cst_14 = arith.constant dense<0xFF800000> : vector<8xf32>
    %33 = vector.multi_reduction <maximumf>, %32, %cst_14 [1] : vector<8x8xf32> to vector<8xf32>
    %34 = vector.shape_cast %33 : vector<8xf32> to vector<8x1xf32>
    %35 = vector.broadcast %34 : vector<8x1xf32> to vector<8x8xf32>
    %36 = arith.subf %32, %35 : vector<8x8xf32>
    %37 = math.exp %36 : vector<8x8xf32>
    %cst_15 = arith.constant dense<0.000000e+00> : vector<8xf32>
    %38 = vector.multi_reduction <add>, %37, %cst_15 [1] : vector<8x8xf32> to vector<8xf32>
    %39 = vector.shape_cast %38 : vector<8xf32> to vector<8x1xf32>
    %40 = tpu.reciprocal %39 {approx = true} : vector<8x1xf32> -> vector<8x1xf32>
    %41 = vector.broadcast %40 : vector<8x1xf32> to vector<8x8xf32>
    %42 = arith.mulf %37, %41 : vector<8x8xf32>
    %43 = arith.truncf %42 : vector<8x8xf32> to vector<8x8xbf16>
    %cst_16 = arith.constant dense<0.000000e+00> : vector<8x64xf32>
    %44 = tpu.matmul %43, %27, %cst_16 {dimension_numbers = #tpu.dot_dimension_numbers<[1], [0], [0], [1], [0, 0, 1, 1], [], []>} : vector<8x8xbf16>, vector<8x64xbf16>, vector<8x64xf32> -> vector<8x64xf32>
    %45 = tpu.concatenate %24, %44 in 1 : vector<8x64xf32>, vector<8x64xf32> -> vector<8x128xf32>
    %46 = arith.truncf %45 : vector<8x128xf32> to vector<8x128xbf16>
    %c0_17 = arith.constant 0 : index
    %c0_18 = arith.constant 0 : index
    %47 = vector.load %arg6[%c0_17, %c0_18] : memref<8x128xbf16, #tpu.memory_space<vmem>>, vector<8x128xbf16>
    tpu.vector_store %arg6[%c0_17, %c0_18], %46 {strides = array<i32>} : memref<8x128xbf16, #tpu.memory_space<vmem>>, vector<8x128xbf16>,
    return
  }
  func.func @transform_0(%arg0: i32, %arg1: i32) -> (i32, i32) {
    %c0_i32 = arith.constant 0 : i32
    return %arg0, %arg1 : i32, i32
  }
  func.func @transform_1(%arg0: i32, %arg1: i32) -> (i32, i32) {
    %c1_i32 = arith.constant 1 : i32
    %0 = arith.addi %c1_i32, %arg1 : i32
    %c0_i32 = arith.constant 0 : i32
    return %arg0, %0 : i32, i32
  }
  func.func @transform_2(%arg0: i32, %arg1: i32) -> (i32, i32) {
    %c2_i32 = arith.constant 2 : i32
    %0 = arith.addi %c2_i32, %arg1 : i32
    %c0_i32 = arith.constant 0 : i32
    return %arg0, %0 : i32, i32
  }
  func.func @transform_3(%arg0: i32, %arg1: i32) -> (i32, i32, i32) {
    %c0_i32 = arith.constant 0 : i32
    %c0_i32_0 = arith.constant 0 : i32
    %c0_i32_1 = arith.constant 0 : i32
    return %arg0, %c0_i32, %c0_i32_0 : i32, i32, i32
  }
  func.func @transform_4(%arg0: i32, %arg1: i32) -> (i32, i32) {
    %c0_i32 = arith.constant 0 : i32
    return %arg0, %arg1 : i32, i32
  }
}

module attributes {stable_mosaic.version = 11 : i64} {
  func.func @_dense_res_ln_kernel(%arg0: i32, %arg1: i32, %arg2: memref<16x128xbf16, #tpu.memory_space<vmem>>, %arg3: memref<128x128xbf16, #tpu.memory_space<vmem>>, %arg4: memref<1x128xf32, #tpu.memory_space<vmem>>, %arg5: memref<16x128xbf16, #tpu.memory_space<vmem>>, %arg6: memref<1x128xf32, #tpu.memory_space<vmem>>, %arg7: memref<1x128xf32, #tpu.memory_space<vmem>>, %arg8: memref<16x128xbf16, #tpu.memory_space<vmem>>, %arg9: memref<16x128xf32, #tpu.memory_space<vmem>>) attributes {dimension_semantics = [#tpu.dimension_semantics<parallel>, #tpu.dimension_semantics<arbitrary>], iteration_bounds = array<i64: 1, 1>, scalar_prefetch = 0 : i64, scratch_operands = 1 : i64, tpu.core_type = #tpu.core_type<tc>, window_params = [{transform_indices = @transform_0, window_bounds = array<i64: 16, 128>}, {transform_indices = @transform_1, window_bounds = array<i64: 128, 128>}, {pipeline_mode = #tpu.pipeline_mode<synchronous>, transform_indices = @transform_2, window_bounds = array<i64: 1, 128>}, {transform_indices = @transform_3, window_bounds = array<i64: 16, 128>}, {pipeline_mode = #tpu.pipeline_mode<synchronous>, transform_indices = @transform_4, window_bounds = array<i64: 1, 128>}, {pipeline_mode = #tpu.pipeline_mode<synchronous>, transform_indices = @transform_5, window_bounds = array<i64: 1, 128>}, {transform_indices = @transform_6, window_bounds = array<i64: 16, 128>}]} {
    %c0_i32 = arith.constant 0 : i32
    %0 = arith.cmpi eq, %arg1, %c0_i32 : i32
    %1 = arith.extui %0 : i1 to i32
    %c0_i32_0 = arith.constant 0 : i32
    %2 = arith.cmpi ne, %1, %c0_i32_0 : i32
    scf.if %2 {
      %cst_10 = arith.constant 0.000000e+00 : f32
      %12 = vector.broadcast %cst_10 : f32 to vector<16x128xf32>
      %c0_11 = arith.constant 0 : index
      %c0_12 = arith.constant 0 : index
      %13 = vector.load %arg9[%c0_11, %c0_12] : memref<16x128xf32, #tpu.memory_space<vmem>>, vector<16x128xf32>
      tpu.vector_store %arg9[%c0_11, %c0_12], %12 {strides = array<i32>} : memref<16x128xf32, #tpu.memory_space<vmem>>, vector<16x128xf32>,
    } else {
    }
    %c0 = arith.constant 0 : index
    %c0_1 = arith.constant 0 : index
    %3 = vector.load %arg9[%c0, %c0_1] : memref<16x128xf32, #tpu.memory_space<vmem>>, vector<16x128xf32>
    %c0_2 = arith.constant 0 : index
    %c0_3 = arith.constant 0 : index
    %4 = vector.load %arg2[%c0_2, %c0_3] : memref<16x128xbf16, #tpu.memory_space<vmem>>, vector<16x128xbf16>
    %c0_4 = arith.constant 0 : index
    %c0_5 = arith.constant 0 : index
    %5 = vector.load %arg3[%c0_4, %c0_5] : memref<128x128xbf16, #tpu.memory_space<vmem>>, vector<128x128xbf16>
    %cst = arith.constant dense<0.000000e+00> : vector<16x128xf32>
    %6 = tpu.matmul %4, %5, %cst {dimension_numbers = #tpu.dot_dimension_numbers<[1], [0], [0], [1], [0, 0, 1, 1], [], []>} : vector<16x128xbf16>, vector<128x128xbf16>, vector<16x128xf32> -> vector<16x128xf32>
    %7 = arith.addf %3, %6 : vector<16x128xf32>
    %c0_6 = arith.constant 0 : index
    %c0_7 = arith.constant 0 : index
    %8 = vector.load %arg9[%c0_6, %c0_7] : memref<16x128xf32, #tpu.memory_space<vmem>>, vector<16x128xf32>
    tpu.vector_store %arg9[%c0_6, %c0_7], %7 {strides = array<i32>} : memref<16x128xf32, #tpu.memory_space<vmem>>, vector<16x128xf32>,
    %c0_i32_8 = arith.constant 0 : i32
    %9 = arith.cmpi eq, %arg1, %c0_i32_8 : i32
    %10 = arith.extui %9 : i1 to i32
    %c0_i32_9 = arith.constant 0 : i32
    %11 = arith.cmpi ne, %10, %c0_i32_9 : i32
    scf.if %11 {
      %c0_10 = arith.constant 0 : index
      %c0_11 = arith.constant 0 : index
      %12 = vector.load %arg9[%c0_10, %c0_11] : memref<16x128xf32, #tpu.memory_space<vmem>>, vector<16x128xf32>
      %c0_12 = arith.constant 0 : index
      %c0_13 = arith.constant 0 : index
      %13 = vector.load %arg4[%c0_12, %c0_13] : memref<1x128xf32, #tpu.memory_space<vmem>>, vector<1x128xf32>
      %14 = vector.broadcast %13 : vector<1x128xf32> to vector<16x128xf32>
      %15 = arith.addf %12, %14 : vector<16x128xf32>
      %c0_14 = arith.constant 0 : index
      %c0_15 = arith.constant 0 : index
      %16 = vector.load %arg5[%c0_14, %c0_15] : memref<16x128xbf16, #tpu.memory_space<vmem>>, vector<16x128xbf16>
      %17 = arith.extf %16 : vector<16x128xbf16> to vector<16x128xf32>
      %18 = arith.addf %15, %17 : vector<16x128xf32>
      %cst_16 = arith.constant dense<0.000000e+00> : vector<16xf32>
      %19 = vector.multi_reduction <add>, %18, %cst_16 [1] : vector<16x128xf32> to vector<16xf32>
      %20 = vector.shape_cast %19 : vector<16xf32> to vector<16x1xf32>
      %cst_17 = arith.constant 1.280000e+02 : f32
      %21 = vector.broadcast %cst_17 : f32 to vector<16x1xf32>
      %22 = arith.divf %20, %21 : vector<16x1xf32>
      %23 = vector.broadcast %22 : vector<16x1xf32> to vector<16x128xf32>
      %24 = arith.subf %18, %23 : vector<16x128xf32>
      %25 = arith.mulf %24, %24 : vector<16x128xf32>
      %cst_18 = arith.constant dense<0.000000e+00> : vector<16xf32>
      %26 = vector.multi_reduction <add>, %25, %cst_18 [1] : vector<16x128xf32> to vector<16xf32>
      %27 = vector.shape_cast %26 : vector<16xf32> to vector<16x1xf32>
      %cst_19 = arith.constant 1.280000e+02 : f32
      %28 = vector.broadcast %cst_19 : f32 to vector<16x1xf32>
      %29 = arith.divf %27, %28 : vector<16x1xf32>
      %cst_20 = arith.constant 9.99999996E-13 : f32
      %30 = vector.broadcast %cst_20 : f32 to vector<16x1xf32>
      %31 = arith.addf %29, %30 : vector<16x1xf32>
      %32 = math.rsqrt %31 : vector<16x1xf32>
      %33 = vector.broadcast %32 : vector<16x1xf32> to vector<16x128xf32>
      %34 = arith.mulf %24, %33 : vector<16x128xf32>
      %c0_21 = arith.constant 0 : index
      %c0_22 = arith.constant 0 : index
      %35 = vector.load %arg6[%c0_21, %c0_22] : memref<1x128xf32, #tpu.memory_space<vmem>>, vector<1x128xf32>
      %36 = vector.broadcast %35 : vector<1x128xf32> to vector<16x128xf32>
      %37 = arith.mulf %34, %36 : vector<16x128xf32>
      %c0_23 = arith.constant 0 : index
      %c0_24 = arith.constant 0 : index
      %38 = vector.load %arg7[%c0_23, %c0_24] : memref<1x128xf32, #tpu.memory_space<vmem>>, vector<1x128xf32>
      %39 = vector.broadcast %38 : vector<1x128xf32> to vector<16x128xf32>
      %40 = arith.addf %37, %39 : vector<16x128xf32>
      %41 = arith.truncf %40 : vector<16x128xf32> to vector<16x128xbf16>
      %c0_25 = arith.constant 0 : index
      %c0_26 = arith.constant 0 : index
      %42 = vector.load %arg8[%c0_25, %c0_26] : memref<16x128xbf16, #tpu.memory_space<vmem>>, vector<16x128xbf16>
      tpu.vector_store %arg8[%c0_25, %c0_26], %41 {strides = array<i32>} : memref<16x128xbf16, #tpu.memory_space<vmem>>, vector<16x128xbf16>,
    } else {
    }
    return
  }
  func.func @transform_0(%arg0: i32, %arg1: i32) -> (i32, i32) {
    %c0_i32 = arith.constant 0 : i32
    return %arg0, %arg1 : i32, i32
  }
  func.func @transform_1(%arg0: i32, %arg1: i32) -> (i32, i32) {
    %c0_i32 = arith.constant 0 : i32
    %c0_i32_0 = arith.constant 0 : i32
    return %arg1, %c0_i32 : i32, i32
  }
  func.func @transform_2(%arg0: i32, %arg1: i32) -> (i32, i32) {
    %c0_i32 = arith.constant 0 : i32
    %c0_i32_0 = arith.constant 0 : i32
    %c0_i32_1 = arith.constant 0 : i32
    return %c0_i32, %c0_i32_0 : i32, i32
  }
  func.func @transform_3(%arg0: i32, %arg1: i32) -> (i32, i32) {
    %c0_i32 = arith.constant 0 : i32
    %c0_i32_0 = arith.constant 0 : i32
    return %arg0, %c0_i32 : i32, i32
  }
  func.func @transform_4(%arg0: i32, %arg1: i32) -> (i32, i32) {
    %c0_i32 = arith.constant 0 : i32
    %c0_i32_0 = arith.constant 0 : i32
    %c0_i32_1 = arith.constant 0 : i32
    return %c0_i32, %c0_i32_0 : i32, i32
  }
  func.func @transform_5(%arg0: i32, %arg1: i32) -> (i32, i32) {
    %c0_i32 = arith.constant 0 : i32
    %c0_i32_0 = arith.constant 0 : i32
    %c0_i32_1 = arith.constant 0 : i32
    return %c0_i32, %c0_i32_0 : i32, i32
  }
  func.func @transform_6(%arg0: i32, %arg1: i32) -> (i32, i32) {
    %c0_i32 = arith.constant 0 : i32
    %c0_i32_0 = arith.constant 0 : i32
    return %arg0, %c0_i32 : i32, i32
  }
}

module attributes {stable_mosaic.version = 11 : i64} {
  func.func @_dense_bias_act_kernel(%arg0: i32, %arg1: i32, %arg2: i32, %arg3: memref<16x128xbf16, #tpu.memory_space<vmem>>, %arg4: memref<128x256xbf16, #tpu.memory_space<vmem>>, %arg5: memref<1x256xf32, #tpu.memory_space<vmem>>, %arg6: memref<16x256xbf16, #tpu.memory_space<vmem>>, %arg7: memref<16x256xf32, #tpu.memory_space<vmem>>) attributes {dimension_semantics = [#tpu.dimension_semantics<parallel>, #tpu.dimension_semantics<parallel>, #tpu.dimension_semantics<arbitrary>], iteration_bounds = array<i64: 1, 1, 1>, scalar_prefetch = 0 : i64, scratch_operands = 1 : i64, tpu.core_type = #tpu.core_type<tc>, window_params = [{transform_indices = @transform_0, window_bounds = array<i64: 16, 128>}, {transform_indices = @transform_1, window_bounds = array<i64: 128, 256>}, {transform_indices = @transform_2, window_bounds = array<i64: 1, 256>}, {transform_indices = @transform_3, window_bounds = array<i64: 16, 256>}]} {
    %c0_i32 = arith.constant 0 : i32
    %0 = arith.cmpi eq, %arg2, %c0_i32 : i32
    %1 = arith.extui %0 : i1 to i32
    %c0_i32_0 = arith.constant 0 : i32
    %2 = arith.cmpi ne, %1, %c0_i32_0 : i32
    scf.if %2 {
      %cst_10 = arith.constant 0.000000e+00 : f32
      %12 = vector.broadcast %cst_10 : f32 to vector<16x256xf32>
      %c0_11 = arith.constant 0 : index
      %c0_12 = arith.constant 0 : index
      %13 = vector.load %arg7[%c0_11, %c0_12] : memref<16x256xf32, #tpu.memory_space<vmem>>, vector<16x256xf32>
      tpu.vector_store %arg7[%c0_11, %c0_12], %12 {strides = array<i32>} : memref<16x256xf32, #tpu.memory_space<vmem>>, vector<16x256xf32>,
    } else {
    }
    %c0 = arith.constant 0 : index
    %c0_1 = arith.constant 0 : index
    %3 = vector.load %arg7[%c0, %c0_1] : memref<16x256xf32, #tpu.memory_space<vmem>>, vector<16x256xf32>
    %c0_2 = arith.constant 0 : index
    %c0_3 = arith.constant 0 : index
    %4 = vector.load %arg3[%c0_2, %c0_3] : memref<16x128xbf16, #tpu.memory_space<vmem>>, vector<16x128xbf16>
    %c0_4 = arith.constant 0 : index
    %c0_5 = arith.constant 0 : index
    %5 = vector.load %arg4[%c0_4, %c0_5] : memref<128x256xbf16, #tpu.memory_space<vmem>>, vector<128x256xbf16>
    %cst = arith.constant dense<0.000000e+00> : vector<16x256xf32>
    %6 = tpu.matmul %4, %5, %cst {dimension_numbers = #tpu.dot_dimension_numbers<[1], [0], [0], [1], [0, 0, 1, 1], [], []>} : vector<16x128xbf16>, vector<128x256xbf16>, vector<16x256xf32> -> vector<16x256xf32>
    %7 = arith.addf %3, %6 : vector<16x256xf32>
    %c0_6 = arith.constant 0 : index
    %c0_7 = arith.constant 0 : index
    %8 = vector.load %arg7[%c0_6, %c0_7] : memref<16x256xf32, #tpu.memory_space<vmem>>, vector<16x256xf32>
    tpu.vector_store %arg7[%c0_6, %c0_7], %7 {strides = array<i32>} : memref<16x256xf32, #tpu.memory_space<vmem>>, vector<16x256xf32>,
    %c0_i32_8 = arith.constant 0 : i32
    %9 = arith.cmpi eq, %arg2, %c0_i32_8 : i32
    %10 = arith.extui %9 : i1 to i32
    %c0_i32_9 = arith.constant 0 : i32
    %11 = arith.cmpi ne, %10, %c0_i32_9 : i32
    scf.if %11 {
      %c0_10 = arith.constant 0 : index
      %c0_11 = arith.constant 0 : index
      %12 = vector.load %arg7[%c0_10, %c0_11] : memref<16x256xf32, #tpu.memory_space<vmem>>, vector<16x256xf32>
      %c0_12 = arith.constant 0 : index
      %c0_13 = arith.constant 0 : index
      %13 = vector.load %arg5[%c0_12, %c0_13] : memref<1x256xf32, #tpu.memory_space<vmem>>, vector<1x256xf32>
      %14 = vector.broadcast %13 : vector<1x256xf32> to vector<16x256xf32>
      %15 = arith.addf %12, %14 : vector<16x256xf32>
      %cst_14 = arith.constant 5.000000e-01 : f32
      %16 = vector.broadcast %cst_14 : f32 to vector<16x256xf32>
      %17 = arith.mulf %16, %15 : vector<16x256xf32>
      %cst_15 = arith.constant 4.471500e-02 : f32
      %18 = vector.broadcast %cst_15 : f32 to vector<16x256xf32>
      %19 = arith.mulf %18, %15 : vector<16x256xf32>
      %20 = arith.mulf %19, %15 : vector<16x256xf32>
      %21 = arith.mulf %20, %15 : vector<16x256xf32>
      %22 = arith.addf %15, %21 : vector<16x256xf32>
      %cst_16 = arith.constant 0.797884583 : f32
      %23 = vector.broadcast %cst_16 : f32 to vector<16x256xf32>
      %24 = arith.mulf %23, %22 : vector<16x256xf32>
      %25 = math.tanh %24 : vector<16x256xf32>
      %cst_17 = arith.constant 1.000000e+00 : f32
      %26 = vector.broadcast %cst_17 : f32 to vector<16x256xf32>
      %27 = arith.addf %26, %25 : vector<16x256xf32>
      %28 = arith.mulf %17, %27 : vector<16x256xf32>
      %29 = arith.truncf %28 : vector<16x256xf32> to vector<16x256xbf16>
      %c0_18 = arith.constant 0 : index
      %c0_19 = arith.constant 0 : index
      %30 = vector.load %arg6[%c0_18, %c0_19] : memref<16x256xbf16, #tpu.memory_space<vmem>>, vector<16x256xbf16>
      tpu.vector_store %arg6[%c0_18, %c0_19], %29 {strides = array<i32>} : memref<16x256xbf16, #tpu.memory_space<vmem>>, vector<16x256xbf16>,
    } else {
    }
    return
  }
  func.func @transform_0(%arg0: i32, %arg1: i32, %arg2: i32) -> (i32, i32) {
    %c0_i32 = arith.constant 0 : i32
    return %arg0, %arg2 : i32, i32
  }
  func.func @transform_1(%arg0: i32, %arg1: i32, %arg2: i32) -> (i32, i32) {
    %c0_i32 = arith.constant 0 : i32
    return %arg2, %arg1 : i32, i32
  }
  func.func @transform_2(%arg0: i32, %arg1: i32, %arg2: i32) -> (i32, i32) {
    %c0_i32 = arith.constant 0 : i32
    %c0_i32_0 = arith.constant 0 : i32
    return %c0_i32, %arg1 : i32, i32
  }
  func.func @transform_3(%arg0: i32, %arg1: i32, %arg2: i32) -> (i32, i32) {
    %c0_i32 = arith.constant 0 : i32
    return %arg0, %arg1 : i32, i32
  }
}

module attributes {stable_mosaic.version = 11 : i64} {
  func.func @_dense_res_ln_kernel(%arg0: i32, %arg1: i32, %arg2: memref<16x256xbf16, #tpu.memory_space<vmem>>, %arg3: memref<256x128xbf16, #tpu.memory_space<vmem>>, %arg4: memref<1x128xf32, #tpu.memory_space<vmem>>, %arg5: memref<16x128xbf16, #tpu.memory_space<vmem>>, %arg6: memref<1x128xf32, #tpu.memory_space<vmem>>, %arg7: memref<1x128xf32, #tpu.memory_space<vmem>>, %arg8: memref<16x128xbf16, #tpu.memory_space<vmem>>, %arg9: memref<16x128xf32, #tpu.memory_space<vmem>>) attributes {dimension_semantics = [#tpu.dimension_semantics<parallel>, #tpu.dimension_semantics<arbitrary>], iteration_bounds = array<i64: 1, 1>, scalar_prefetch = 0 : i64, scratch_operands = 1 : i64, tpu.core_type = #tpu.core_type<tc>, window_params = [{transform_indices = @transform_0, window_bounds = array<i64: 16, 256>}, {transform_indices = @transform_1, window_bounds = array<i64: 256, 128>}, {pipeline_mode = #tpu.pipeline_mode<synchronous>, transform_indices = @transform_2, window_bounds = array<i64: 1, 128>}, {transform_indices = @transform_3, window_bounds = array<i64: 16, 128>}, {pipeline_mode = #tpu.pipeline_mode<synchronous>, transform_indices = @transform_4, window_bounds = array<i64: 1, 128>}, {pipeline_mode = #tpu.pipeline_mode<synchronous>, transform_indices = @transform_5, window_bounds = array<i64: 1, 128>}, {transform_indices = @transform_6, window_bounds = array<i64: 16, 128>}]} {
    %c0_i32 = arith.constant 0 : i32
    %0 = arith.cmpi eq, %arg1, %c0_i32 : i32
    %1 = arith.extui %0 : i1 to i32
    %c0_i32_0 = arith.constant 0 : i32
    %2 = arith.cmpi ne, %1, %c0_i32_0 : i32
    scf.if %2 {
      %cst_10 = arith.constant 0.000000e+00 : f32
      %12 = vector.broadcast %cst_10 : f32 to vector<16x128xf32>
      %c0_11 = arith.constant 0 : index
      %c0_12 = arith.constant 0 : index
      %13 = vector.load %arg9[%c0_11, %c0_12] : memref<16x128xf32, #tpu.memory_space<vmem>>, vector<16x128xf32>
      tpu.vector_store %arg9[%c0_11, %c0_12], %12 {strides = array<i32>} : memref<16x128xf32, #tpu.memory_space<vmem>>, vector<16x128xf32>,
    } else {
    }
    %c0 = arith.constant 0 : index
    %c0_1 = arith.constant 0 : index
    %3 = vector.load %arg9[%c0, %c0_1] : memref<16x128xf32, #tpu.memory_space<vmem>>, vector<16x128xf32>
    %c0_2 = arith.constant 0 : index
    %c0_3 = arith.constant 0 : index
    %4 = vector.load %arg2[%c0_2, %c0_3] : memref<16x256xbf16, #tpu.memory_space<vmem>>, vector<16x256xbf16>
    %c0_4 = arith.constant 0 : index
    %c0_5 = arith.constant 0 : index
    %5 = vector.load %arg3[%c0_4, %c0_5] : memref<256x128xbf16, #tpu.memory_space<vmem>>, vector<256x128xbf16>
    %cst = arith.constant dense<0.000000e+00> : vector<16x128xf32>
    %6 = tpu.matmul %4, %5, %cst {dimension_numbers = #tpu.dot_dimension_numbers<[1], [0], [0], [1], [0, 0, 1, 1], [], []>} : vector<16x256xbf16>, vector<256x128xbf16>, vector<16x128xf32> -> vector<16x128xf32>
    %7 = arith.addf %3, %6 : vector<16x128xf32>
    %c0_6 = arith.constant 0 : index
    %c0_7 = arith.constant 0 : index
    %8 = vector.load %arg9[%c0_6, %c0_7] : memref<16x128xf32, #tpu.memory_space<vmem>>, vector<16x128xf32>
    tpu.vector_store %arg9[%c0_6, %c0_7], %7 {strides = array<i32>} : memref<16x128xf32, #tpu.memory_space<vmem>>, vector<16x128xf32>,
    %c0_i32_8 = arith.constant 0 : i32
    %9 = arith.cmpi eq, %arg1, %c0_i32_8 : i32
    %10 = arith.extui %9 : i1 to i32
    %c0_i32_9 = arith.constant 0 : i32
    %11 = arith.cmpi ne, %10, %c0_i32_9 : i32
    scf.if %11 {
      %c0_10 = arith.constant 0 : index
      %c0_11 = arith.constant 0 : index
      %12 = vector.load %arg9[%c0_10, %c0_11] : memref<16x128xf32, #tpu.memory_space<vmem>>, vector<16x128xf32>
      %c0_12 = arith.constant 0 : index
      %c0_13 = arith.constant 0 : index
      %13 = vector.load %arg4[%c0_12, %c0_13] : memref<1x128xf32, #tpu.memory_space<vmem>>, vector<1x128xf32>
      %14 = vector.broadcast %13 : vector<1x128xf32> to vector<16x128xf32>
      %15 = arith.addf %12, %14 : vector<16x128xf32>
      %c0_14 = arith.constant 0 : index
      %c0_15 = arith.constant 0 : index
      %16 = vector.load %arg5[%c0_14, %c0_15] : memref<16x128xbf16, #tpu.memory_space<vmem>>, vector<16x128xbf16>
      %17 = arith.extf %16 : vector<16x128xbf16> to vector<16x128xf32>
      %18 = arith.addf %15, %17 : vector<16x128xf32>
      %cst_16 = arith.constant dense<0.000000e+00> : vector<16xf32>
      %19 = vector.multi_reduction <add>, %18, %cst_16 [1] : vector<16x128xf32> to vector<16xf32>
      %20 = vector.shape_cast %19 : vector<16xf32> to vector<16x1xf32>
      %cst_17 = arith.constant 1.280000e+02 : f32
      %21 = vector.broadcast %cst_17 : f32 to vector<16x1xf32>
      %22 = arith.divf %20, %21 : vector<16x1xf32>
      %23 = vector.broadcast %22 : vector<16x1xf32> to vector<16x128xf32>
      %24 = arith.subf %18, %23 : vector<16x128xf32>
      %25 = arith.mulf %24, %24 : vector<16x128xf32>
      %cst_18 = arith.constant dense<0.000000e+00> : vector<16xf32>
      %26 = vector.multi_reduction <add>, %25, %cst_18 [1] : vector<16x128xf32> to vector<16xf32>
      %27 = vector.shape_cast %26 : vector<16xf32> to vector<16x1xf32>
      %cst_19 = arith.constant 1.280000e+02 : f32
      %28 = vector.broadcast %cst_19 : f32 to vector<16x1xf32>
      %29 = arith.divf %27, %28 : vector<16x1xf32>
      %cst_20 = arith.constant 9.99999996E-13 : f32
      %30 = vector.broadcast %cst_20 : f32 to vector<16x1xf32>
      %31 = arith.addf %29, %30 : vector<16x1xf32>
      %32 = math.rsqrt %31 : vector<16x1xf32>
      %33 = vector.broadcast %32 : vector<16x1xf32> to vector<16x128xf32>
      %34 = arith.mulf %24, %33 : vector<16x128xf32>
      %c0_21 = arith.constant 0 : index
      %c0_22 = arith.constant 0 : index
      %35 = vector.load %arg6[%c0_21, %c0_22] : memref<1x128xf32, #tpu.memory_space<vmem>>, vector<1x128xf32>
      %36 = vector.broadcast %35 : vector<1x128xf32> to vector<16x128xf32>
      %37 = arith.mulf %34, %36 : vector<16x128xf32>
      %c0_23 = arith.constant 0 : index
      %c0_24 = arith.constant 0 : index
      %38 = vector.load %arg7[%c0_23, %c0_24] : memref<1x128xf32, #tpu.memory_space<vmem>>, vector<1x128xf32>
      %39 = vector.broadcast %38 : vector<1x128xf32> to vector<16x128xf32>
      %40 = arith.addf %37, %39 : vector<16x128xf32>
      %41 = arith.truncf %40 : vector<16x128xf32> to vector<16x128xbf16>
      %c0_25 = arith.constant 0 : index
      %c0_26 = arith.constant 0 : index
      %42 = vector.load %arg8[%c0_25, %c0_26] : memref<16x128xbf16, #tpu.memory_space<vmem>>, vector<16x128xbf16>
      tpu.vector_store %arg8[%c0_25, %c0_26], %41 {strides = array<i32>} : memref<16x128xbf16, #tpu.memory_space<vmem>>, vector<16x128xbf16>,
    } else {
    }
    return
  }
  func.func @transform_0(%arg0: i32, %arg1: i32) -> (i32, i32) {
    %c0_i32 = arith.constant 0 : i32
    return %arg0, %arg1 : i32, i32
  }
  func.func @transform_1(%arg0: i32, %arg1: i32) -> (i32, i32) {
    %c0_i32 = arith.constant 0 : i32
    %c0_i32_0 = arith.constant 0 : i32
    return %arg1, %c0_i32 : i32, i32
  }
  func.func @transform_2(%arg0: i32, %arg1: i32) -> (i32, i32) {
    %c0_i32 = arith.constant 0 : i32
    %c0_i32_0 = arith.constant 0 : i32
    %c0_i32_1 = arith.constant 0 : i32
    return %c0_i32, %c0_i32_0 : i32, i32
  }
  func.func @transform_3(%arg0: i32, %arg1: i32) -> (i32, i32) {
    %c0_i32 = arith.constant 0 : i32
    %c0_i32_0 = arith.constant 0 : i32
    return %arg0, %c0_i32 : i32, i32
  }
  func.func @transform_4(%arg0: i32, %arg1: i32) -> (i32, i32) {
    %c0_i32 = arith.constant 0 : i32
    %c0_i32_0 = arith.constant 0 : i32
    %c0_i32_1 = arith.constant 0 : i32
    return %c0_i32, %c0_i32_0 : i32, i32
  }
  func.func @transform_5(%arg0: i32, %arg1: i32) -> (i32, i32) {
    %c0_i32 = arith.constant 0 : i32
    %c0_i32_0 = arith.constant 0 : i32
    %c0_i32_1 = arith.constant 0 : i32
    return %c0_i32, %c0_i32_0 : i32, i32
  }
  func.func @transform_6(%arg0: i32, %arg1: i32) -> (i32, i32) {
    %c0_i32 = arith.constant 0 : i32
    %c0_i32_0 = arith.constant 0 : i32
    return %arg0, %c0_i32 : i32, i32
  }
}

module attributes {stable_mosaic.version = 11 : i64} {
  func.func @_pool_cls_kernel(%arg0: memref<2x128xbf16, #tpu.memory_space<vmem>>, %arg1: memref<128x128xbf16, #tpu.memory_space<vmem>>, %arg2: memref<1x128xf32, #tpu.memory_space<vmem>>, %arg3: memref<128x128xbf16, #tpu.memory_space<vmem>>, %arg4: memref<1x128xf32, #tpu.memory_space<vmem>>, %arg5: memref<2x128xf32, #tpu.memory_space<vmem>>) attributes {dimension_semantics = [], scalar_prefetch = 0 : i64, scratch_operands = 0 : i64, tpu.core_type = #tpu.core_type<tc>} {
    %c0 = arith.constant 0 : index
    %c0_0 = arith.constant 0 : index
    %0 = vector.load %arg0[%c0, %c0_0] : memref<2x128xbf16, #tpu.memory_space<vmem>>, vector<2x128xbf16>
    %c0_1 = arith.constant 0 : index
    %c0_2 = arith.constant 0 : index
    %1 = vector.load %arg1[%c0_1, %c0_2] : memref<128x128xbf16, #tpu.memory_space<vmem>>, vector<128x128xbf16>
    %cst = arith.constant dense<0.000000e+00> : vector<2x128xf32>
    %2 = tpu.matmul %0, %1, %cst {dimension_numbers = #tpu.dot_dimension_numbers<[1], [0], [0], [1], [0, 0, 1, 1], [], []>} : vector<2x128xbf16>, vector<128x128xbf16>, vector<2x128xf32> -> vector<2x128xf32>
    %c0_3 = arith.constant 0 : index
    %c0_4 = arith.constant 0 : index
    %3 = vector.load %arg2[%c0_3, %c0_4] : memref<1x128xf32, #tpu.memory_space<vmem>>, vector<1x128xf32>
    %4 = vector.broadcast %3 : vector<1x128xf32> to vector<2x128xf32>
    %5 = arith.addf %2, %4 : vector<2x128xf32>
    %6 = math.tanh %5 : vector<2x128xf32>
    %7 = arith.truncf %6 : vector<2x128xf32> to vector<2x128xbf16>
    %c0_5 = arith.constant 0 : index
    %c0_6 = arith.constant 0 : index
    %8 = vector.load %arg3[%c0_5, %c0_6] : memref<128x128xbf16, #tpu.memory_space<vmem>>, vector<128x128xbf16>
    %cst_7 = arith.constant dense<0.000000e+00> : vector<2x128xf32>
    %9 = tpu.matmul %7, %8, %cst_7 {dimension_numbers = #tpu.dot_dimension_numbers<[1], [0], [0], [1], [0, 0, 1, 1], [], []>} : vector<2x128xbf16>, vector<128x128xbf16>, vector<2x128xf32> -> vector<2x128xf32>
    %c0_8 = arith.constant 0 : index
    %c0_9 = arith.constant 0 : index
    %10 = vector.load %arg4[%c0_8, %c0_9] : memref<1x128xf32, #tpu.memory_space<vmem>>, vector<1x128xf32>
    %11 = vector.broadcast %10 : vector<1x128xf32> to vector<2x128xf32>
    %12 = arith.addf %9, %11 : vector<2x128xf32>
    %c0_10 = arith.constant 0 : index
    %c0_11 = arith.constant 0 : index
    %13 = vector.load %arg5[%c0_10, %c0_11] : memref<2x128xf32, #tpu.memory_space<vmem>>, vector<2x128xf32>
    tpu.vector_store %arg5[%c0_10, %c0_11], %12 {strides = array<i32>} : memref<2x128xf32, #tpu.memory_space<vmem>>, vector<2x128xf32>,
    return
  }
}

</mosaic_0001>

<bundles_post_ra>
// kernel: mbert_base_d_forward.12
= control target key start
LH: loop header
LB: loop body
LE: loop exit
PB: predicated region body
PF: predicated region fallthrough
CT: control target
= control target key end

     0   :  { %s139_s0 = inlined_call_operand.vmem [shape: f32[16,128], index: 0, kind: input, shape index: {}]   ;;  %s140_s1 = inlined_call_operand.vmem [shape: f32[16,128], index: 1, kind: input, shape index: {}]   ;;  %s141_s2 = inlined_call_operand.vmem [shape: f32[1,128], index: 2, kind: input, shape index: {}]   ;;  %s142_s3 = inlined_call_operand.vmem [shape: f32[1,128], index: 3, kind: input, shape index: {}]   ;;  %s143_s4 = inlined_call_operand.vmem [shape: bf16[16,128], index: 4, kind: output, shape index: {}]  }
   0x1   :  { %v17_v0 = vld [vmem:[%s139_s0] sm:$0xff]  ;;  %v18_v2 = vld [vmem:[%s139_s0 + $0x8] sm:$0xff] }
   0x2   :  { %v19_v1 = vld [vmem:[%s140_s1] sm:$0xff]  ;;  %v20_v4 = vld [vmem:[%s140_s1 + $0x8] sm:$0xff] }
   0x3   :  { %v21_v3 = vadd.f32 %v19_v1, %v17_v0  ;;  %v22_v5 = vadd.f32 %v20_v4, %v18_v2  ;;  %v78_v22 = vld [vmem:[%s141_s2] ss:$0 sm:$0xff] }
   0x4   :  { %v79_v26 = vld [vmem:[%s142_s3] ss:$0 sm:$0xff] }
   0x5   :  { %23 = vadd.xlane.f32.xlu0 %v21_v3 }
   0x9   :  { %25 = vadd.xlane.f32.xlu0 %v22_v5 }
  0x92   :  { %v24_v6 = vpop.xlane.xlu0 %23 }
  0x93   :  { %v28_v7 = vmul.f32 0.0078125, %v24_v6 }
  0x95   :  { %v30_v8 = vsub.f32 %v21_v3, %v28_v7 }
  0x96   :  { %v26_v9 = vpop.xlane.xlu0 %25 }
  0x97   :  { %v29_v10 = vmul.f32 0.0078125, %v26_v9  ;;  %v32_v11 = vmul.f32 %v30_v8, %v30_v8 }
  0x99   :  { %v31_v12 = vsub.f32 %v22_v5, %v29_v10  ;;  %34 = vadd.xlane.f32.xlu1 %v32_v11 }
  0x9b   :  { %v33_v13 = vmul.f32 %v31_v12, %v31_v12 }
  0x9d   :  { %36 = vadd.xlane.f32.xlu1 %v33_v13 }
 0x126   :  { %v35_v14 = vpop.xlane.xlu1 %34 }
 0x127   :  { %v38_v15 = vmul.f32 0.0078125, %v35_v14 }
 0x129   :  { %v40_v16 = vadd.f32 1e-12, %v38_v15 }
 0x12a   :  { %v37_v17 = vpop.xlane.xlu1 %36 }
 0x12b   :  { %89 = vrsqrt.f32 %v40_v16  ;;  %v39_v18 = vmul.f32 0.0078125, %v37_v17 }
 0x12d   :  { %v41_v19 = vadd.f32 1e-12, %v39_v18 }
 0x12f   :  { %91 = vrsqrt.f32 %v41_v19 }
 0x135   :  { %v90_v20 = vpop.eup %89 }
 0x136   :  { %v44_v21 = vmul.f32 %v90_v20, %v30_v8 }
 0x138   :  { %v53_v24 = vmul.f32 %v78_v22, %v44_v21 }
 0x139   :  { %v92_v23 = vpop.eup %91 }
 0x13a   :  { %v45_v25 = vmul.f32 %v92_v23, %v31_v12  ;;  %v62_v28 = vadd.f32 %v79_v26, %v53_v24 }
 0x13c   :  { %v54_v27 = vmul.f32 %v78_v22, %v45_v25 }
 0x13e   :  { %v63_v29 = vadd.f32 %v79_v26, %v54_v27 }
 0x140   :  { %v87_v30 = vpack.c.bf16 %v63_v29, %v62_v28 }
 0x142   :  { %88 = vst [vmem:[%s143_s4] sm:$0xff] %v87_v30  }

// kernel: mbert_base_d_forward.15
= control target key start
LH: loop header
LB: loop body
LE: loop exit
PB: predicated region body
PF: predicated region fallthrough
CT: control target
= control target key end

     0   :  { %v293_v0 = vmov 0.0   ;;  %vm294_vm0 = vmmov 0   ;;  %s372_s1 = inlined_call_operand.vmem [shape: bf16[128,128], index: 1, kind: input, shape index: {}]   ;;  %s373_s0 = inlined_call_operand.vmem [shape: bf16[16,128], index: 0, kind: input, shape index: {}]   ;;  %s374_s3 = inlined_call_operand.vmem [shape: bf16[16,128], index: 3, kind: input, shape index: {}]   ;;  %s375_s2 = inlined_call_operand.vmem [shape: f32[1,128], index: 2, kind: input, shape index: {}]   ;;  %s376_s4 = inlined_call_operand.vmem [shape: f32[1,128], index: 4, kind: input, shape index: {}]   ;;  %s377_s5 = inlined_call_operand.vmem [shape: f32[1,128], index: 5, kind: input, shape index: {}]   ;;  %s378_s6 = inlined_call_operand.vmem [shape: bf16[16,128], index: 6, kind: output, shape index: {}]  }
   0x1   :  { %258 = vmatprep.subr.bf16.mxu0 %v293_v0  ;;  %v280_v1 = vld [vmem:[%s372_s1] sm:$0xff]   ;;  %274 = vmatprep.mubr.msk.bf16.mxu0 %vm294_vm0, %v293_v0  ;;  %v281_v2 = vld [vmem:[%s372_s1 + $0x8] sm:$0xff]   ;;  %v282_v3 = vld [vmem:[%s372_s1 + $0x10] sm:$0xff]  }
   0x2   :  { %259 = vmatpush3.bf16.msra.mxu0 %v280_v1  ;;  %v283_v4 = vld [vmem:[%s372_s1 + $0x18] sm:$0xff]   ;;  %v284_v5 = vld [vmem:[%s372_s1 + $0x20] sm:$0xff]   ;;  %v285_v6 = vld [vmem:[%s372_s1 + $0x28] sm:$0xff]  }
   0x3   :  { %260 = vmatprep.subr.bf16.mxu0 %v293_v0  ;;  %v286_v7 = vld [vmem:[%s372_s1 + $0x30] sm:$0xff]   ;;  %v287_v8 = vld [vmem:[%s372_s1 + $0x38] sm:$0xff]   ;;  %v288_v9 = vld [vmem:[%s373_s0] sm:$0xff]  }
   0x4   :  { %v241_v10 = vld [vmem:[%s374_s3] sm:$0xff]  }
   0x5   :  { %v233_v11 = vld [vmem:[%s375_s2] ss:$0 sm:$0xff]  ;;  %v242_v12 = vunpack.c.l.bf16 %v241_v10  ;;  %v243_v20 = vunpack.c.h.bf16 %v241_v10 }
   0x6   :  { %261 = vmatpush3.bf16.msra.mxu0 %v281_v2  ;;  %v234_v38 = vld [vmem:[%s376_s4] ss:$0 sm:$0xff] }
   0x7   :  { %262 = vmatprep.subr.bf16.mxu0 %v293_v0  ;;  %v235_v42 = vld [vmem:[%s377_s5] ss:$0 sm:$0xff] }
   0xa   :  { %263 = vmatpush3.bf16.msra.mxu0 %v282_v3 }
   0xb   :  { %264 = vmatprep.subr.bf16.mxu0 %v293_v0 }
   0xe   :  { %265 = vmatpush3.bf16.msra.mxu0 %v283_v4 }
   0xf   :  { %266 = vmatprep.subr.bf16.mxu0 %v293_v0 }
  0x12   :  { %267 = vmatpush3.bf16.msra.mxu0 %v284_v5 }
  0x13   :  { %268 = vmatprep.subr.bf16.mxu0 %v293_v0 }
  0x16   :  { %269 = vmatpush3.bf16.msra.mxu0 %v285_v6 }
  0x17   :  { %270 = vmatprep.subr.bf16.mxu0 %v293_v0 }
  0x1a   :  { %271 = vmatpush3.bf16.msra.mxu0 %v286_v7 }
  0x1b   :  { %272 = vmatprep.subr.bf16.mxu0 %v293_v0 }
  0x1e   :  { %273 = vmatpush3.bf16.msra.mxu0 %v287_v8 }
  0x21   :  { %275 = vmatmul.mubr.bf16.vlgmr.msra.gmra.mrb[0].mxu0 %v288_v9 }
  0xf4   :  { %v138_v13 = vpop.f32.mrb[0].mxu0 }
  0xf5   :  { %v161_v14 = vadd.f32 %v233_v11, %v138_v13  ;;  %v276_v15 = vpop.f32.mrb[1].mxu0 }
  0xf6   :  { %v141_v16 = vpop.f32.mrb[2].mxu0 }
  0xf7   :  { %v162_v17 = vadd.f32 %v233_v11, %v141_v16  ;;  %v277_v18 = vpop.f32.mrb[3].mxu0  ;;  %v167_v19 = vadd.f32 %v242_v12, %v161_v14 }
  0xf9   :  { %169 = vadd.xlane.f32.xlu0 %v167_v19  ;;  %v168_v21 = vadd.f32 %v243_v20, %v162_v17 }
  0xfd   :  { %171 = vadd.xlane.f32.xlu0 %v168_v21 }
 0x186   :  { %v170_v22 = vpop.xlane.xlu0 %169 }
 0x187   :  { %v174_v23 = vmul.f32 0.0078125, %v170_v22 }
 0x189   :  { %v176_v24 = vsub.f32 %v167_v19, %v174_v23 }
 0x18a   :  { %v172_v25 = vpop.xlane.xlu0 %171 }
 0x18b   :  { %v175_v26 = vmul.f32 0.0078125, %v172_v25  ;;  %v178_v27 = vmul.f32 %v176_v24, %v176_v24 }
 0x18d   :  { %v177_v28 = vsub.f32 %v168_v21, %v175_v26  ;;  %180 = vadd.xlane.f32.xlu1 %v178_v27 }
 0x18f   :  { %v179_v29 = vmul.f32 %v177_v28, %v177_v28 }
 0x191   :  { %182 = vadd.xlane.f32.xlu1 %v179_v29 }
 0x21a   :  { %v181_v30 = vpop.xlane.xlu1 %180 }
 0x21b   :  { %v184_v31 = vmul.f32 0.0078125, %v181_v30 }
 0x21d   :  { %v186_v32 = vadd.f32 1e-12, %v184_v31 }
 0x21e   :  { %v183_v33 = vpop.xlane.xlu1 %182 }
 0x21f   :  { %289 = vrsqrt.f32 %v186_v32  ;;  %v185_v34 = vmul.f32 0.0078125, %v183_v33 }
 0x221   :  { %v187_v35 = vadd.f32 1e-12, %v185_v34 }
 0x223   :  { %291 = vrsqrt.f32 %v187_v35 }
 0x229   :  { %v290_v36 = vpop.eup %289 }
 0x22a   :  { %v190_v37 = vmul.f32 %v290_v36, %v176_v24 }
 0x22c   :  { %v199_v40 = vmul.f32 %v234_v38, %v190_v37 }
 0x22d   :  { %v292_v39 = vpop.eup %291 }
 0x22e   :  { %v191_v41 = vmul.f32 %v292_v39, %v177_v28  ;;  %v208_v44 = vadd.f32 %v235_v42, %v199_v40 }
 0x230   :  { %v200_v43 = vmul.f32 %v234_v38, %v191_v41 }
 0x232   :  { %v209_v45 = vadd.f32 %v235_v42, %v200_v43 }
 0x234   :  { %v247_v46 = vpack.c.bf16 %v209_v45, %v208_v44 }
 0x236   :  { %248 = vst [vmem:[%s378_s6] sm:$0xff] %v247_v46  }

// kernel: mbert_base_d_forward.14
= control target key start
LH: loop header
LB: loop body
LE: loop exit
PB: predicated region body
PF: predicated region fallthrough
CT: control target
= control target key end

     0   :  { %s835_s15 = smov 0   ;;  %s837_s16 = smov 0   ;;  %s908_s0 = inlined_call_operand.vmem [shape: bf16[16,384], index: 0, kind: input, shape index: {}, may-alias: {0,1,2}]   ;;  %s909_s1 = inlined_call_operand.vmem [shape: bf16[16,384], index: 1, kind: input, shape index: {}, may-alias: {0,1,2}]   ;;  %s910_s2 = inlined_call_operand.vmem [shape: bf16[16,384], index: 2, kind: input, shape index: {}, may-alias: {0,1,2}]   ;;  %s911_s3 = inlined_call_operand.vmem [shape: f32[2,1,8], index: 3, kind: input, shape index: {}]   ;;  %s912_s4 = inlined_call_operand.vmem [shape: bf16[16,128], index: 4, kind: output, shape index: {}]  }
   0x1   :  { %s839_s17 = smov 0  }
   0x2 LB: > { %s26_s18 = sadd.s32 1, %s801_s16  ;;  %p691_p0 = scmp.ge.s32.totalorder %s805_s17, 1  ;;  %s805_s17 = sphi %s839_s17, %s14_s17   ;;  %s801_s16 = sphi %s837_s16, %s914_s16   ;;  %s797_s15 = sphi %s835_s15, %s913_s15  }
   0x3   : > { %p28_p1 = scmp.ge.s32.totalorder %s26_s18, 2  ;;  %p227_p2 = scmp.lt.s32.totalorder %s805_s17, 3 }
   0x5   : > { %s916_s18 = smov (%p28_p1, %s26_s18), 0  ;;  %p228_p3 = pnand %p691_p0, %p227_p2 }
   0x6   : > { %p279_p4 = scmp.lt.s32.totalorder (!%p228_p3), %s797_s15, 1  ;;  %v807_v0 = vmov (!%p228_p3), 0.0   ;;  %vm808_vm0 = vmmov (!%p228_p3), 0   ;;  %vm322_vm1 = vcmask (!%p228_p3), 523264   ;;  %vm377_vm2 = vcmask (!%p228_p3), 64512   ;;  %s809_s30 = smov (!%p228_p3), 64  }
   0x7   : > { %231 = sbr.rel (%p228_p3) target bundleno = 1431 (0x597), region = 36  ;;  %718 = vmatprep.subr.bf16.mxu0 (!%p228_p3), %v807_v0  ;;  %720 = vmatprep.mubr.msk.bf16.mxu0 (!%p228_p3), %vm808_vm0, %v807_v0  ;;  %vm393_vm3 = vcmask (!%p228_p3), 1043456  }
   0x8   : > { %724 = vmatprep.subr.bf16.mxu1 (!%p228_p3), %v807_v0  ;;  %726 = vmatprep.mubr.msk.bf16.mxu1 (!%p228_p3), %vm808_vm0, %v807_v0 }
   0xe   : > { %s918_s15 = smov (!%p279_p4, %s797_s15), 1 }
   0xf   : > { %s858_s19 = smul.u32 12, %s918_s15  ;;  %s309_s29 = scalar_lea.vmem %s911_s3, %s918_s15 }
  0x10   : > { %v697_v5 = vld [vmem:[%s309_s29] ss:$0 sm:$0xff]  ;;  %s695_s9 = sshll.u32 %s918_s15, 2 }
  0x11   : > { %s707_s20 = sadd.s32 4, %s858_s19  ;;  %s286_s26 = scalar_lea.vmem %s908_s0, %s858_s19 }
  0x12   : > { %s295_s23 = scalar_lea.vmem %s909_s1, %s707_s20  ;;  %v319_v3 = vld [vmem:[%s286_s26] sm:$0xf]  ;;  %s709_s5 = sadd.s32 8, %s858_s19 }
  0x13   : > { %v320_v1 = vld [vmem:[%s295_s23] sm:$0xf]  ;;  %v699_v13 = vcombine.low %v319_v3, %v319_v3  ;;  %s305_s8 = scalar_lea.vmem %s910_s2, %s709_s5  ;;  %s316_s12 = scalar_lea.vmem %s912_s4, %s695_s9 }
  0x14   : > { %v327_v2 = vsel %vm322_vm1, %v320_v1, 0  ;;  %v700_v12 = vcombine.low %v320_v1, %v320_v1  ;;  %v321_v19 = vld [vmem:[%s305_s8] sm:$0xf] }
  0x15   : > { %719 = vmatpush3.bf16.xpose.msra.mxu0 %v327_v2  ;;  %v395_v20 = vsel %vm393_vm3, %v321_v19, 0  ;;  %v702_v39 = vcombine.low %v321_v19, %v321_v19 }
  0x16   : > { %736 = vmatprep.subr.bf16.mxu0 %v807_v0  ;;  %445 = vrot.lane.b32.xlu1 %v700_v12, %s809_s30 }
  0x17   : > { %725 = vmatpush3.bf16.msra.mxu1 %v395_v20 }
  0x18   : > { %730 = vmatprep.subr.bf16.mxu1 %v807_v0 }
  0x1a   : > { %440 = vrot.lane.b32.xlu1 %v699_v13, %s809_s30 }
  0x1c   : > { %721 = vmatmul.mubr.msk.bf16.vlgmr.msra.gmra.mrb[0].mxu0 %vm322_vm1, %v319_v3 }
  0x1d   : > { %738 = vmatprep.mubr.msk.bf16.mxu0 %vm808_vm0, %v807_v0 }
  0x88   : > { %v446_v23 = vpop.permute.xlu1 %445 }
  0x89   : > { %v451_v25 = vsel %vm322_vm1, %v446_v23, 0 }
  0x8c   : > { %v441_v27 = vpop.permute.xlu1 %440 }
  0xef   : > { %v363_v4 = vpop.f32.mrb[0].mxu0 }
  0xf0   : > { %v369_v6 = vmul.f32 0.125, %v363_v4  ;;  %v722_v7 = vpop.f32.mrb[1].mxu0 }
  0xf1   : > { %v366_v8 = vpop.f32.mrb[2].mxu0 }
  0xf2   : > { %v723_v9 = vpop.f32.mrb[3].mxu0  ;;  %v376_v10 = vadd.f32 %v697_v5, %v369_v6 }
  0xf4   : > { %v378_v11 = vsel %vm377_vm2, %v376_v10, -inf }
  0xf5   : > { %379 = vmax.xlane.f32.xlu0 %v378_v11 }
 0x182   : > { %v380_v14 = vpop.xlane.xlu0 %379 }
 0x183   : > { %v381_v15 = vsub.f32 %v376_v10, %v380_v14 }
 0x185   : > { %v382_v16 = vmul.f32 1.442695, %v381_v15 }
 0x187   : > { %775 = vpow2.f32 %v382_v16 }
 0x191   : > { %v776_v17 = vpop.eup %775 }
 0x192   : > { %v384_v18 = vsel %vm377_vm2, %v776_v17, 0.0 }
 0x193   : > { %385 = vadd.xlane.f32.xlu0 %v384_v18 }
 0x220   : > { %v386_v21 = vpop.xlane.xlu0 %385 }
 0x221   : > { %777 = vrcp.f32 %v386_v21 }
 0x22b   : > { %v778_v22 = vpop.eup %777 }
 0x22c   : > { %v388_v24 = vmul.f32 %v778_v22, %v776_v17 }
 0x22e   : > { %v389_v26 = vpack.c.bf16 %v388_v24, %v388_v24 }
 0x230   : > { %727 = vmatmul.mubr.msk.bf16.vlgmr.msra.gmra.mrb[0].mxu1 %vm377_vm2, %v389_v26 }
 0x231   : > { %731 = vmatpush3.bf16.xpose.msra.mxu1 %v451_v25  ;;  %732 = vmatprep.mubr.msk.bf16.mxu1 %vm808_vm0, %v807_v0 }
 0x238   : > { %733 = vmatmul.mubr.msk.bf16.vlgmr.msra.gmra.mrb[4].mxu1 %vm322_vm1, %v441_v27 }
 0x303   : > { %v431_v28 = vpop.f32.mrb[0].mxu1 }
 0x304   : > { %v728_v29 = vpop.f32.mrb[1].mxu1 }
 0x305   : > { %v434_v30 = vpop.f32.mrb[2].mxu1 }
 0x306   : > { %v729_v31 = vpop.f32.mrb[3].mxu1 }
 0x30b   : > { %v487_v32 = vpop.f32.mrb[4].mxu1 }
 0x30c   : > { %v493_v33 = vmul.f32 0.125, %v487_v32  ;;  %v734_v34 = vpop.f32.mrb[5].mxu1 }
 0x30d   : > { %v490_v35 = vpop.f32.mrb[6].mxu1 }
 0x30e   : > { %v735_v36 = vpop.f32.mrb[7].mxu1  ;;  %v494_v37 = vadd.f32 %v697_v5, %v493_v33 }
 0x310   : > { %v495_v38 = vsel %vm377_vm2, %v494_v37, -inf }
 0x311   : > { %496 = vmax.xlane.f32.xlu0 %v495_v38 }
 0x327   : > { %510 = vrot.lane.b32.xlu0 %v702_v39, %s809_s30 }
 0x39e   : > { %v497_v40 = vpop.xlane.xlu0 %496 }
 0x39f   : > { %v498_v41 = vsub.f32 %v494_v37, %v497_v40 }
 0x3a1   : > { %v499_v42 = vmul.f32 1.442695, %v498_v41 }
 0x3a2   : > { %v511_v45 = vpop.permute.xlu0 %510 }
 0x3a3   : > { %779 = vpow2.f32 %v499_v42  ;;  %v516_v46 = vsel %vm393_vm3, %v511_v45, 0 }
 0x3a4   : > { %737 = vmatpush3.bf16.msra.mxu0 %v516_v46 }
 0x3ad   : > { %v780_v43 = vpop.eup %779 }
 0x3ae   : > { %v501_v44 = vsel %vm377_vm2, %v780_v43, 0.0 }
 0x3af   : > { %502 = vadd.xlane.f32.xlu1 %v501_v44 }
 0x43c   : > { %v503_v47 = vpop.xlane.xlu1 %502 }
 0x43d   : > { %781 = vrcp.f32 %v503_v47 }
 0x447   : > { %v782_v48 = vpop.eup %781 }
 0x448   : > { %v505_v49 = vmul.f32 %v782_v48, %v780_v43 }
 0x44a   : > { %v506_v50 = vpack.c.bf16 %v505_v49, %v505_v49 }
 0x44c   : > { %739 = vmatmul.mubr.msk.bf16.vlgmr.msra.gmra.mrb[4].mxu0 %vm377_vm2, %v506_v50 }
 0x51f   : > { %v552_v51 = vpop.f32.mrb[4].mxu0 }
 0x520   : > { %559 = vrot.lane.b32.xlu0 %v552_v51, %s809_s30  ;;  %v740_v52 = vpop.f32.mrb[5].mxu0 }
 0x521   : > { %v555_v53 = vpop.f32.mrb[6].mxu0 }
 0x522   : > { %v741_v54 = vpop.f32.mrb[7].mxu0 }
 0x592   : > { %v560_v55 = vpop.permute.xlu0 %559 }
 0x593   : > { %v562_v56 = vsel %vm322_vm1, %v431_v28, %v560_v55 }
 0x594   : > { %v563_v57 = vpack.c.bf16 %v562_v56, %v562_v56 }
 0x596   : > { %564 = vst [vmem:[%s316_s12] sm:$0xf] %v563_v57 }
 0x597 PF: > { %s14_s17 = sadd.s32 1, %s805_s17   ;;  %s913_s15 = smov %s801_s16 }
 0x598   : > { %p11_p5 = scmp.ge.s32.totalorder %s14_s17, 4   ;;  %s914_s16 = smov %s916_s18 }
 0x59a   :  { %13 = sbr.rel (!%p11_p5) target bundleno = 2 (0x2), region = 75 }

// kernel: mbert_base_d_forward.13
= control target key start
LH: loop header
LB: loop body
LE: loop exit
PB: predicated region body
PF: predicated region fallthrough
CT: control target
= control target key end

     0   :  { %v453_v0 = vmov 0.0   ;;  %vm454_vm0 = vmmov 0   ;;  %v455_v3 = vmov 0   ;;  %v306_v27 = vlaneseq  ;;  %s566_s1 = inlined_call_operand.vmem [shape: bf16[128,384], index: 1, kind: input, shape index: {}]   ;;  %s567_s0 = inlined_call_operand.vmem [shape: bf16[16,128], index: 0, kind: input, shape index: {}]   ;;  %s568_s2 = inlined_call_operand.vmem [shape: f32[1,384], index: 2, kind: input, shape index: {}]   ;;  %s569_s3 = inlined_call_operand.vmem [shape: bf16[16,384], index: 3, kind: output, shape index: {}]  }
   0x1   :  { %397 = vmatprep.subr.bf16.mxu1 %v453_v0  ;;  %v420_v1 = vld [vmem:[%s566_s1 + $0x4] ss:$12 sps:$4 sm:$0xff]   ;;  %413 = vmatprep.mubr.msk.bf16.mxu1 %vm454_vm0, %v453_v0  ;;  %v422_v2 = vld [vmem:[%s566_s1 + $0x8] ss:$12 sps:$4 sm:$0xff]   ;;  %v423_v4 = vld [vmem:[%s566_s1] ss:$12 sps:$4 sm:$0xff]  }
   0x2   :  { %231 = vmatprep.mubr.bf16.mxu0 %v455_v3  ;;  %199 = vmatprep.subr.bf16.mxu0 %v420_v1  ;;  %v424_v5 = vld [vmem:[%s566_s1 + $0x1c] ss:$12 sps:$4 sm:$0xff]   ;;  %v426_v6 = vld [vmem:[%s566_s1 + $0x20] ss:$12 sps:$4 sm:$0xff]   ;;  %v427_v7 = vld [vmem:[%s566_s1 + $0x18] ss:$12 sps:$4 sm:$0xff]  }
   0x3   :  { %398 = vmatpush3.bf16.msra.mxu1 %v422_v2  ;;  %200 = vmatpush1.bf16.msra.mxu0 %v423_v4  ;;  %v428_v8 = vld [vmem:[%s566_s1 + $0x34] ss:$12 sps:$4 sm:$0xff]   ;;  %v430_v9 = vld [vmem:[%s566_s1 + $0x38] ss:$12 sps:$4 sm:$0xff]   ;;  %v431_v10 = vld [vmem:[%s566_s1 + $0x30] ss:$12 sps:$4 sm:$0xff]  }
   0x4   :  { %399 = vmatprep.subr.bf16.mxu1 %v453_v0  ;;  %201 = vmatprep.subr.bf16.mxu0 %v424_v5  ;;  %v432_v11 = vld [vmem:[%s566_s1 + $0x4c] ss:$12 sps:$4 sm:$0xff]   ;;  %v434_v12 = vld [vmem:[%s566_s1 + $0x50] ss:$12 sps:$4 sm:$0xff]   ;;  %v435_v13 = vld [vmem:[%s566_s1 + $0x48] ss:$12 sps:$4 sm:$0xff]  }
   0x5   :  { %v436_v14 = vld [vmem:[%s566_s1 + $0x64] ss:$12 sps:$4 sm:$0xff]   ;;  %v438_v15 = vld [vmem:[%s566_s1 + $0x68] ss:$12 sps:$4 sm:$0xff]   ;;  %v439_v16 = vld [vmem:[%s566_s1 + $0x60] ss:$12 sps:$4 sm:$0xff]  }
   0x6   :  { %v440_v17 = vld [vmem:[%s566_s1 + $0x7c] ss:$12 sps:$4 sm:$0xff]   ;;  %v442_v18 = vld [vmem:[%s566_s1 + $0x80] ss:$12 sps:$4 sm:$0xff]   ;;  %v443_v19 = vld [vmem:[%s566_s1 + $0x78] ss:$12 sps:$4 sm:$0xff]  }
   0x7   :  { %400 = vmatpush3.bf16.msra.mxu1 %v426_v6  ;;  %202 = vmatpush1.bf16.msra.mxu0 %v427_v7  ;;  %v444_v20 = vld [vmem:[%s566_s1 + $0x94] ss:$12 sps:$4 sm:$0xff]   ;;  %v446_v21 = vld [vmem:[%s566_s1 + $0x98] ss:$12 sps:$4 sm:$0xff]   ;;  %v447_v22 = vld [vmem:[%s566_s1 + $0x90] ss:$12 sps:$4 sm:$0xff]  }
   0x8   :  { %401 = vmatprep.subr.bf16.mxu1 %v453_v0  ;;  %203 = vmatprep.subr.bf16.mxu0 %v428_v8  ;;  %v448_v23 = vld [vmem:[%s566_s1 + $0xac] ss:$12 sps:$4 sm:$0xff]   ;;  %v450_v24 = vld [vmem:[%s566_s1 + $0xb0] ss:$12 sps:$4 sm:$0xff]   ;;  %v451_v25 = vld [vmem:[%s566_s1 + $0xa8] ss:$12 sps:$4 sm:$0xff]  }
   0x9   :  { %v452_v26 = vld [vmem:[%s567_s0] sm:$0xff]   ;;  %v307_v28 = vshrl.u32 %v306_v27, 7 }
   0xa   :  { %v304_v30 = vld [vmem:[%s568_s2] sm:$0x7] }
   0xb   :  { %402 = vmatpush3.bf16.msra.mxu1 %v430_v9  ;;  %204 = vmatpush1.bf16.msra.mxu0 %v431_v10  ;;  %v316_v29 = vsub.s32 2, %v307_v28  ;;  %v308_v31 = vsub.s32 0, %v307_v28  ;;  %v312_v32 = vsub.s32 1, %v307_v28 }
   0xc   :  { %403 = vmatprep.subr.bf16.mxu1 %v453_v0  ;;  %205 = vmatprep.subr.bf16.mxu0 %v432_v11 }
   0xd   :  { %v317_v33 = vrot.slane %v304_v30, %v316_v29  ;;  %v309_v34 = vrot.slane %v304_v30, %v308_v31  ;;  %v313_v35 = vrot.slane %v304_v30, %v312_v32 }
   0xf   :  { %404 = vmatpush3.bf16.msra.mxu1 %v434_v12  ;;  %206 = vmatpush1.bf16.msra.mxu0 %v435_v13 }
  0x10   :  { %405 = vmatprep.subr.bf16.mxu1 %v453_v0  ;;  %207 = vmatprep.subr.bf16.mxu0 %v436_v14 }
  0x13   :  { %406 = vmatpush3.bf16.msra.mxu1 %v438_v15  ;;  %208 = vmatpush1.bf16.msra.mxu0 %v439_v16 }
  0x14   :  { %407 = vmatprep.subr.bf16.mxu1 %v453_v0  ;;  %209 = vmatprep.subr.bf16.mxu0 %v440_v17 }
  0x17   :  { %408 = vmatpush3.bf16.msra.mxu1 %v442_v18  ;;  %210 = vmatpush1.bf16.msra.mxu0 %v443_v19 }
  0x18   :  { %409 = vmatprep.subr.bf16.mxu1 %v453_v0  ;;  %211 = vmatprep.subr.bf16.mxu0 %v444_v20 }
  0x1b   :  { %410 = vmatpush3.bf16.msra.mxu1 %v446_v21  ;;  %212 = vmatpush1.bf16.msra.mxu0 %v447_v22 }
  0x1c   :  { %411 = vmatprep.subr.bf16.mxu1 %v453_v0  ;;  %213 = vmatprep.subr.bf16.mxu0 %v448_v23 }
  0x1f   :  { %412 = vmatpush3.bf16.msra.mxu1 %v450_v24  ;;  %214 = vmatpush1.bf16.msra.mxu0 %v451_v25 }
  0x22   :  { %414 = vmatmul.mubr.bf16.vlgmr.msra.gmra.mrb[0].mxu1 %v452_v26  ;;  %232 = vmatmul.mubr.bf16.vlgmr.msra.gmra.mrb[0].mxu0 %v452_v26 }
  0xf5   :  { %v276_v36 = vpop.f32.mrb[0].mxu1  ;;  %v233_v38 = vpop.f32.mrb[0].mxu0 }
  0xf6   :  { %v323_v37 = vadd.f32 %v317_v33, %v276_v36  ;;  %v415_v39 = vpop.f32.mrb[1].mxu1  ;;  %v321_v40 = vadd.f32 %v309_v34, %v233_v38  ;;  %v235_v41 = vpop.f32.mrb[1].mxu0 }
  0xf7   :  { %v279_v42 = vpop.f32.mrb[2].mxu1  ;;  %v322_v44 = vadd.f32 %v313_v35, %v235_v41  ;;  %v237_v46 = vpop.f32.mrb[2].mxu0 }
  0xf8   :  { %v385_v43 = vpack.c.bf16 %v323_v37, %v323_v37  ;;  %v326_v45 = vadd.f32 %v317_v33, %v279_v42  ;;  %v416_v47 = vpop.f32.mrb[3].mxu1  ;;  %v324_v48 = vadd.f32 %v309_v34, %v237_v46  ;;  %v239_v49 = vpop.f32.mrb[3].mxu0 }
  0xf9   :  { %v384_v50 = vpack.c.bf16 %v322_v44, %v321_v40  ;;  %v325_v52 = vadd.f32 %v313_v35, %v239_v49 }
  0xfa   :  { %348 = vst [vmem:[%s569_s3 + $0x8] sm:$0xf] %v385_v43  ;;  %v387_v51 = vpack.c.bf16 %v326_v45, %v326_v45 }
  0xfb   :  { %347 = vst [vmem:[%s569_s3] sm:$0xff] %v384_v50  ;;  %v386_v53 = vpack.c.bf16 %v325_v52, %v324_v48 }
  0xfc   :  { %350 = vst [vmem:[%s569_s3 + $0x14] sm:$0xf] %v387_v51 }
  0xfd   :  { %349 = vst [vmem:[%s569_s3 + $0xc] sm:$0xff] %v386_v53 }

// kernel: mbert_base_d_forward.16
= control target key start
LH: loop header
LB: loop body
LE: loop exit
PB: predicated region body
PF: predicated region fallthrough
CT: control target
= control target key end

     0   :  { %v314_v1 = vmov 0   ;;  %v191_v18 = vlaneseq  ;;  %s395_s1 = inlined_call_operand.vmem [shape: bf16[128,256], index: 1, kind: input, shape index: {}]   ;;  %s396_s0 = inlined_call_operand.vmem [shape: bf16[16,128], index: 0, kind: input, shape index: {}]   ;;  %s397_s2 = inlined_call_operand.vmem [shape: f32[1,256], index: 2, kind: input, shape index: {}]   ;;  %s398_s3 = inlined_call_operand.vmem [shape: bf16[16,256], index: 3, kind: output, shape index: {}]  }
   0x1   :  { %v281_v0 = vld [vmem:[%s395_s1 + $0x4] ss:$8 sps:$4 sm:$0xff]   ;;  %163 = vmatprep.mubr.bf16.mxu0 %v314_v1  ;;  %v283_v2 = vld [vmem:[%s395_s1] ss:$8 sps:$4 sm:$0xff]   ;;  %v284_v3 = vld [vmem:[%s395_s1 + $0x14] ss:$8 sps:$4 sm:$0xff]  }
   0x2   :  { %131 = vmatprep.subr.bf16.mxu0 %v281_v0  ;;  %v286_v4 = vld [vmem:[%s395_s1 + $0x10] ss:$8 sps:$4 sm:$0xff]   ;;  %v287_v5 = vld [vmem:[%s395_s1 + $0x24] ss:$8 sps:$4 sm:$0xff]   ;;  %v289_v6 = vld [vmem:[%s395_s1 + $0x20] ss:$8 sps:$4 sm:$0xff]  }
   0x3   :  { %132 = vmatpush1.bf16.msra.mxu0 %v283_v2  ;;  %v290_v7 = vld [vmem:[%s395_s1 + $0x34] ss:$8 sps:$4 sm:$0xff]   ;;  %v292_v8 = vld [vmem:[%s395_s1 + $0x30] ss:$8 sps:$4 sm:$0xff]   ;;  %v293_v9 = vld [vmem:[%s395_s1 + $0x44] ss:$8 sps:$4 sm:$0xff]  }
   0x4   :  { %133 = vmatprep.subr.bf16.mxu0 %v284_v3  ;;  %v295_v10 = vld [vmem:[%s395_s1 + $0x40] ss:$8 sps:$4 sm:$0xff]   ;;  %v296_v11 = vld [vmem:[%s395_s1 + $0x54] ss:$8 sps:$4 sm:$0xff]   ;;  %v298_v12 = vld [vmem:[%s395_s1 + $0x50] ss:$8 sps:$4 sm:$0xff]  }
   0x5   :  { %v299_v13 = vld [vmem:[%s395_s1 + $0x64] ss:$8 sps:$4 sm:$0xff]   ;;  %v301_v14 = vld [vmem:[%s395_s1 + $0x60] ss:$8 sps:$4 sm:$0xff]   ;;  %v302_v15 = vld [vmem:[%s395_s1 + $0x74] ss:$8 sps:$4 sm:$0xff]  }
   0x6   :  { %v304_v16 = vld [vmem:[%s395_s1 + $0x70] ss:$8 sps:$4 sm:$0xff]   ;;  %v305_v17 = vld [vmem:[%s396_s0] sm:$0xff]   ;;  %v192_v19 = vshrl.u32 %v191_v18, 7 }
   0x7   :  { %134 = vmatpush1.bf16.msra.mxu0 %v286_v4  ;;  %v189_v21 = vld [vmem:[%s397_s2] sm:$0x3] }
   0x8   :  { %135 = vmatprep.subr.bf16.mxu0 %v287_v5  ;;  %v193_v20 = vsub.s32 0, %v192_v19  ;;  %v197_v22 = vsub.s32 1, %v192_v19 }
   0xa   :  { %v194_v23 = vrot.slane %v189_v21, %v193_v20  ;;  %v198_v24 = vrot.slane %v189_v21, %v197_v22 }
   0xb   :  { %136 = vmatpush1.bf16.msra.mxu0 %v289_v6 }
   0xc   :  { %137 = vmatprep.subr.bf16.mxu0 %v290_v7 }
   0xf   :  { %138 = vmatpush1.bf16.msra.mxu0 %v292_v8 }
  0x10   :  { %139 = vmatprep.subr.bf16.mxu0 %v293_v9 }
  0x13   :  { %140 = vmatpush1.bf16.msra.mxu0 %v295_v10 }
  0x14   :  { %141 = vmatprep.subr.bf16.mxu0 %v296_v11 }
  0x17   :  { %142 = vmatpush1.bf16.msra.mxu0 %v298_v12 }
  0x18   :  { %143 = vmatprep.subr.bf16.mxu0 %v299_v13 }
  0x1b   :  { %144 = vmatpush1.bf16.msra.mxu0 %v301_v14 }
  0x1c   :  { %145 = vmatprep.subr.bf16.mxu0 %v302_v15 }
  0x1f   :  { %146 = vmatpush1.bf16.msra.mxu0 %v304_v16 }
  0x22   :  { %164 = vmatmul.mubr.bf16.vlgmr.msra.gmra.mrb[0].mxu0 %v305_v17 }
  0xf5   :  { %v165_v25 = vpop.f32.mrb[0].mxu0 }
  0xf6   :  { %v201_v26 = vadd.f32 %v194_v23, %v165_v25  ;;  %v167_v27 = vpop.f32.mrb[1].mxu0 }
  0xf7   :  { %v202_v28 = vadd.f32 %v198_v24, %v167_v27  ;;  %v169_v29 = vpop.f32.mrb[2].mxu0 }
  0xf8   :  { %v209_v30 = vmul.f32 0.044715, %v201_v26  ;;  %v203_v31 = vadd.f32 %v194_v23, %v169_v29  ;;  %v171_v32 = vpop.f32.mrb[3].mxu0  ;;  %v205_v55 = vmul.f32 0.5, %v201_v26 }
  0xf9   :  { %v210_v33 = vmul.f32 0.044715, %v202_v28  ;;  %v204_v34 = vadd.f32 %v198_v24, %v171_v32  ;;  %v206_v58 = vmul.f32 0.5, %v202_v28 }
  0xfa   :  { %v213_v35 = vmul.f32 %v209_v30, %v201_v26  ;;  %v211_v36 = vmul.f32 0.044715, %v203_v31  ;;  %v207_v62 = vmul.f32 0.5, %v203_v31 }
  0xfb   :  { %v214_v37 = vmul.f32 %v210_v33, %v202_v28  ;;  %v212_v38 = vmul.f32 0.044715, %v204_v34  ;;  %v208_v1 = vmul.f32 0.5, %v204_v34 }
  0xfc   :  { %v217_v39 = vmul.f32 %v213_v35, %v201_v26  ;;  %v215_v40 = vmul.f32 %v211_v36, %v203_v31 }
  0xfd   :  { %v218_v41 = vmul.f32 %v214_v37, %v202_v28  ;;  %v216_v42 = vmul.f32 %v212_v38, %v204_v34 }
  0xfe   :  { %v221_v43 = vadd.f32 %v217_v39, %v201_v26  ;;  %v219_v44 = vmul.f32 %v215_v40, %v203_v31 }
  0xff   :  { %v222_v45 = vadd.f32 %v218_v41, %v202_v28  ;;  %v220_v46 = vmul.f32 %v216_v42, %v204_v34 }
 0x100   :  { %v225_v47 = vmul.f32 0.7978846, %v221_v43  ;;  %v223_v48 = vadd.f32 %v219_v44, %v203_v31 }
 0x101   :  { %v226_v49 = vmul.f32 0.7978846, %v222_v45  ;;  %v224_v50 = vadd.f32 %v220_v46, %v204_v34 }
 0x102   :  { %306 = vtanh.f32 %v225_v47  ;;  %v227_v51 = vmul.f32 0.7978846, %v223_v48 }
 0x103   :  { %308 = vtanh.f32 %v226_v49  ;;  %v228_v52 = vmul.f32 0.7978846, %v224_v50 }
 0x104   :  { %310 = vtanh.f32 %v227_v51 }
 0x105   :  { %312 = vtanh.f32 %v228_v52 }
 0x10c   :  { %v307_v53 = vpop.eup %306 }
 0x10d   :  { %v309_v54 = vpop.eup %308  ;;  %v233_v56 = vadd.f32 1.0, %v307_v53 }
 0x10e   :  { %v311_v57 = vpop.eup %310  ;;  %v234_v59 = vadd.f32 1.0, %v309_v54 }
 0x10f   :  { %v313_v60 = vpop.eup %312  ;;  %v237_v61 = vmul.f32 %v233_v56, %v205_v55  ;;  %v235_v63 = vadd.f32 1.0, %v311_v57 }
 0x110   :  { %v238_v0 = vmul.f32 %v234_v59, %v206_v58  ;;  %v236_v2 = vadd.f32 1.0, %v313_v60 }
 0x111   :  { %v239_v3 = vmul.f32 %v235_v63, %v207_v62 }
 0x112   :  { %v278_v4 = vpack.c.bf16 %v238_v0, %v237_v61  ;;  %v240_v5 = vmul.f32 %v236_v2, %v208_v1 }
 0x114   :  { %253 = vst [vmem:[%s398_s3] sm:$0xff] %v278_v4  ;;  %v279_v6 = vpack.c.bf16 %v240_v5, %v239_v3 }
 0x116   :  { %254 = vst [vmem:[%s398_s3 + $0x8] sm:$0xff] %v279_v6 }

// kernel: mbert_base_d_forward.23
= control target key start
LH: loop header
LB: loop body
LE: loop exit
PB: predicated region body
PF: predicated region fallthrough
CT: control target
= control target key end

     0   :  { %v383_v1 = vmov 0.0   ;;  %vm384_vm0 = vmmov 0   ;;  %s485_s0 = inlined_call_operand.vmem [shape: bf16[2,128], index: 0, kind: input, shape index: {}]   ;;  %s486_s1 = inlined_call_operand.vmem [shape: bf16[128,128], index: 1, kind: input, shape index: {}]   ;;  %s487_s2 = inlined_call_operand.vmem [shape: f32[1,128], index: 2, kind: input, shape index: {}]   ;;  %s488_s3 = inlined_call_operand.vmem [shape: bf16[128,128], index: 3, kind: input, shape index: {}]   ;;  %s489_s4 = inlined_call_operand.vmem [shape: f32[1,128], index: 4, kind: input, shape index: {}]   ;;  %s490_s5 = inlined_call_operand.hbm [shape: f32[2,128], index: 5, kind: output, shape index: {}]  }
   0x1   :  { %v341_v0 = vld [vmem:[%s486_s1] sm:$0xff]   ;;  %298 = vmatprep.subr.bf16.mxu0 %v383_v1  ;;  %318 = vmatprep.subr.bf16.mxu1 %v383_v1  ;;  %v342_v2 = vld [vmem:[%s486_s1 + $0x8] sm:$0xff]   ;;  %v343_v3 = vld [vmem:[%s486_s1 + $0x10] sm:$0xff]  }
   0x2   :  { %299 = vmatpush3.bf16.msra.mxu0 %v341_v0  ;;  %314 = vmatprep.mubr.msk.bf16.mxu0 %vm384_vm0, %v383_v1  ;;  %v349_v4 = vld [vmem:[%s488_s3] sm:$0xff]   ;;  %v344_v5 = vld [vmem:[%s486_s1 + $0x18] sm:$0xff]   ;;  %v350_v6 = vld [vmem:[%s488_s3 + $0x8] sm:$0xff]  }
   0x3   :  { %300 = vmatprep.subr.bf16.mxu0 %v383_v1  ;;  %334 = vmatprep.mubr.msk.bf16.mxu1 %vm384_vm0, %v383_v1  ;;  %v345_v7 = vld [vmem:[%s486_s1 + $0x20] sm:$0xff]   ;;  %v351_v8 = vld [vmem:[%s488_s3 + $0x10] sm:$0xff]  }
   0x4   :  { %319 = vmatpush3.bf16.msra.mxu1 %v349_v4 }
   0x5   :  { %320 = vmatprep.subr.bf16.mxu1 %v383_v1 }
   0x6   :  { %301 = vmatpush3.bf16.msra.mxu0 %v342_v2 }
   0x7   :  { %302 = vmatprep.subr.bf16.mxu0 %v383_v1 }
   0x8   :  { %321 = vmatpush3.bf16.msra.mxu1 %v350_v6 }
   0xa   :  { %303 = vmatpush3.bf16.msra.mxu0 %v343_v3 }
   0xb   :  { %304 = vmatprep.subr.bf16.mxu0 %v383_v1 }
   0xe   :  { %305 = vmatpush3.bf16.msra.mxu0 %v344_v5 }
   0xf   :  { %306 = vmatprep.subr.bf16.mxu0 %v383_v1 }
  0x10   :  { %10 = vsyncpa [#allocation3], 0  ;;  %322 = vmatprep.subr.bf16.mxu1 %v383_v1  ;;  %v346_v9 = vld [vmem:[%s486_s1 + $0x28] sm:$0xff]   ;;  %v352_v10 = vld [vmem:[%s488_s3 + $0x18] sm:$0xff]   ;;  %s385_s29 = smov [#allocation2]  }
  0x11   :  { %323 = vmatpush3.bf16.msra.mxu1 %v351_v8  ;;  %v347_v11 = vld [vmem:[%s486_s1 + $0x30] sm:$0xff]   ;;  %v348_v12 = vld [vmem:[%s486_s1 + $0x38] sm:$0xff]   ;;  %v22_v13 = vld [vmem:[%s485_s0] sm:$0x1] }
  0x12   :  { %307 = vmatpush3.bf16.msra.mxu0 %v345_v7  ;;  %324 = vmatprep.subr.bf16.mxu1 %v383_v1  ;;  %v353_v14 = vld [vmem:[%s488_s3 + $0x20] sm:$0xff]   ;;  %v354_v15 = vld [vmem:[%s488_s3 + $0x28] sm:$0xff]   ;;  %v355_v16 = vld [vmem:[%s488_s3 + $0x30] sm:$0xff]  }
  0x13   :  { %308 = vmatprep.subr.bf16.mxu0 %v383_v1  ;;  %v356_v17 = vld [vmem:[%s488_s3 + $0x38] sm:$0xff]   ;;  %v262_v18 = vld [vmem:[%s487_s2] ss:$0 sm:$0xff]  ;;  %s254_s3 = sshll.u32 %s385_s29, 4  ;;  %s255_s3 = int_to_ptr.vmem [resolvable:$true] %s254_s3 }
  0x14   :  { %v271_v26 = vld [vmem:[%s489_s4] ss:$0 sm:$0xff]  ;;  %s359_s2 = scalar_lea.vmem %s255_s3, 32  ;;  %p364_p1 = scmp.lt.s32.totalorder %s255_s3, %s255_s3 }
  0x15   :  { %325 = vmatpush3.bf16.msra.mxu1 %v352_v10  ;;  %p360_p0 = scmp.ne.s32.totalorder %s255_s3, %s359_s2  ;;  %p365_p2 = scmp.lt.s32.totalorder %s359_s2, %s359_s2 }
  0x16   :  { %309 = vmatpush3.bf16.msra.mxu0 %v346_v9  ;;  %326 = vmatprep.subr.bf16.mxu1 %v383_v1 }
  0x17   :  { %310 = vmatprep.subr.bf16.mxu0 %v383_v1  ;;  %p366_p3 = por %p365_p2, %p364_p1 }
  0x19   :  { %327 = vmatpush3.bf16.msra.mxu1 %v353_v14  ;;  %p367_p4 = pnand %p366_p3, %p360_p0 }
  0x1a   :  { %311 = vmatpush3.bf16.msra.mxu0 %v347_v11  ;;  %328 = vmatprep.subr.bf16.mxu1 %v383_v1 }
  0x1b   :  { %312 = vmatprep.subr.bf16.mxu0 %v383_v1 }
  0x1d   :  { %329 = vmatpush3.bf16.msra.mxu1 %v354_v15 }
  0x1e   :  { %313 = vmatpush3.bf16.msra.mxu0 %v348_v12  ;;  %330 = vmatprep.subr.bf16.mxu1 %v383_v1 }
  0x21   :  { %315 = vmatmul.mubr.bf16.vlgmr.msra.gmra.mrb[0].mxu0 %v22_v13  ;;  %331 = vmatpush3.bf16.msra.mxu1 %v355_v16 }
  0x22   :  { %332 = vmatprep.subr.bf16.mxu1 %v383_v1 }
  0x25   :  { %333 = vmatpush3.bf16.msra.mxu1 %v356_v17 }
  0xf4   :  { %v128_v19 = vpop.f32.mrb[0].mxu0 }
  0xf5   :  { %v129_v20 = vadd.f32 %v262_v18, %v128_v19  ;;  %v316_v21 = vpop.f32.mrb[1].mxu0 }
  0xf6   :  { %v131_v22 = vpop.f32.mrb[2].mxu0 }
  0xf7   :  { %357 = vtanh.f32 %v129_v20  ;;  %v317_v23 = vpop.f32.mrb[3].mxu0 }
 0x101   :  { %v358_v24 = vpop.eup %357 }
 0x102   :  { %v135_v25 = vpack.c.bf16 %v358_v24, %v358_v24 }
 0x104   :  { %335 = vmatmul.mubr.bf16.vlgmr.msra.gmra.mrb[0].mxu1 %v135_v25 }
 0x1d7   :  { %v241_v27 = vpop.f32.mrb[0].mxu1 }
 0x1d8   :  { %v242_v28 = vadd.f32 %v271_v26, %v241_v27  ;;  %v336_v29 = vpop.f32.mrb[1].mxu1 }
 0x1d9   :  { %v244_v30 = vpop.f32.mrb[2].mxu1 }
 0x1da   :  { %247 = vst [vmem:[#allocation2] sm:$0x3] %v242_v28  ;;  %v337_v31 = vpop.f32.mrb[3].mxu1 }
 0x1db   :  { %370 = shalt.err (!%p367_p4)
}
 0x1dc   :  { %s371_s4 = scalar_lea.hbm %s490_s5, 32 }
 0x1dd   :  { %p372_p5 = scmp.ne.s32.totalorder %s490_s5, %s371_s4  ;;  %p375_p6 = scmp.lt.u32.totalorder %s371_s4, %s490_s5 }
 0x1df   :  { %p377_p7 = pnand %p375_p6, %p372_p5 }
 0x1e1   :  { %380 = shalt.err (!%p377_p7)
}
 0x1e2   :  { %257 = dma.vmem_to_hbm [thread:$0]  %s255_s3, 32, %s490_s5, [#allocation3]  }
 0x1e3   :  { %381 = dma.done.wait [#allocation3], 32  }
 0x1e4   :  { %382 = vsyncadd [#allocation3], 4294967264 }
 0x1e5   :  { %261 = vsyncpa [#allocation3], 1 }

// kernel: mbert_base_d_forward.17
= control target key start
LH: loop header
LB: loop body
LE: loop exit
PB: predicated region body
PF: predicated region fallthrough
CT: control target
= control target key end

     0   :  { %s475_s1 = inlined_call_operand.vmem [shape: bf16[256,128], index: 1, kind: input, shape index: {}]   ;;  %s476_s0 = inlined_call_operand.vmem [shape: bf16[16,256], index: 0, kind: input, shape index: {}]   ;;  %s477_s3 = inlined_call_operand.vmem [shape: bf16[16,128], index: 3, kind: input, shape index: {}]   ;;  %s478_s2 = inlined_call_operand.vmem [shape: f32[1,128], index: 2, kind: input, shape index: {}]   ;;  %s479_s4 = inlined_call_operand.vmem [shape: f32[1,128], index: 4, kind: input, shape index: {}]   ;;  %s480_s5 = inlined_call_operand.vmem [shape: f32[1,128], index: 5, kind: input, shape index: {}]   ;;  %s481_s6 = inlined_call_operand.vmem [shape: bf16[16,128], index: 6, kind: output, shape index: {}]  }
   0x1   :  { %v348_v0 = vld [vmem:[%s475_s1 + $0x40] sm:$0xff]   ;;  %v350_v2 = vld [vmem:[%s475_s1 + $0x48] sm:$0xff]   ;;  %v352_v4 = vld [vmem:[%s475_s1 + $0x50] sm:$0xff]  }
   0x2   :  { %v349_v1 = vld [vmem:[%s475_s1] sm:$0xff]   ;;  %326 = vmatprep.subr.bf16.mxu0 %v348_v0  ;;  %v351_v3 = vld [vmem:[%s475_s1 + $0x8] sm:$0xff]   ;;  %v353_v5 = vld [vmem:[%s475_s1 + $0x10] sm:$0xff]  }
   0x3   :  { %327 = vmatpush3.bf16.msra.mxu0 %v349_v1  ;;  %v354_v6 = vld [vmem:[%s475_s1 + $0x58] sm:$0xff]   ;;  %v356_v8 = vld [vmem:[%s475_s1 + $0x60] sm:$0xff]   ;;  %v358_v10 = vld [vmem:[%s475_s1 + $0x68] sm:$0xff]  }
   0x4   :  { %328 = vmatprep.subr.bf16.mxu0 %v350_v2  ;;  %v355_v7 = vld [vmem:[%s475_s1 + $0x18] sm:$0xff]   ;;  %v357_v9 = vld [vmem:[%s475_s1 + $0x20] sm:$0xff]   ;;  %v359_v12 = vld [vmem:[%s475_s1 + $0x28] sm:$0xff]  }
   0x5   :  { %v366_v11 = vld [vmem:[%s476_s0 + $0x4] ss:$8 sps:$4 sm:$0xff]   ;;  %v360_v13 = vld [vmem:[%s475_s1 + $0x70] sm:$0xff]   ;;  %v362_v15 = vld [vmem:[%s475_s1 + $0x78] sm:$0xff]  }
   0x6   :  { %204 = vmatprep.mubr.bf16.mxu0 %v366_v11  ;;  %v361_v14 = vld [vmem:[%s475_s1 + $0x30] sm:$0xff]   ;;  %v363_v16 = vld [vmem:[%s475_s1 + $0x38] sm:$0xff]   ;;  %v364_v17 = vld [vmem:[%s476_s0] ss:$8 sps:$4 sm:$0xff]  }
   0x7   :  { %329 = vmatpush3.bf16.msra.mxu0 %v351_v3  ;;  %v318_v18 = vld [vmem:[%s477_s3] sm:$0xff]  }
   0x8   :  { %330 = vmatprep.subr.bf16.mxu0 %v352_v4  ;;  %v310_v21 = vld [vmem:[%s478_s2] ss:$0 sm:$0xff]  ;;  %v319_v24 = vunpack.c.l.bf16 %v318_v18  ;;  %v320_v30 = vunpack.c.h.bf16 %v318_v18 }
   0x9   :  { %v311_v48 = vld [vmem:[%s479_s4] ss:$0 sm:$0xff] }
   0xa   :  { %v312_v52 = vld [vmem:[%s480_s5] ss:$0 sm:$0xff] }
   0xb   :  { %331 = vmatpush3.bf16.msra.mxu0 %v353_v5 }
   0xc   :  { %332 = vmatprep.subr.bf16.mxu0 %v354_v6 }
   0xf   :  { %333 = vmatpush3.bf16.msra.mxu0 %v355_v7 }
  0x10   :  { %334 = vmatprep.subr.bf16.mxu0 %v356_v8 }
  0x13   :  { %335 = vmatpush3.bf16.msra.mxu0 %v357_v9 }
  0x14   :  { %336 = vmatprep.subr.bf16.mxu0 %v358_v10 }
  0x17   :  { %337 = vmatpush3.bf16.msra.mxu0 %v359_v12 }
  0x18   :  { %338 = vmatprep.subr.bf16.mxu0 %v360_v13 }
  0x1b   :  { %339 = vmatpush3.bf16.msra.mxu0 %v361_v14 }
  0x1c   :  { %340 = vmatprep.subr.bf16.mxu0 %v362_v15 }
  0x1f   :  { %341 = vmatpush3.bf16.msra.mxu0 %v363_v16 }
  0x22   :  { %205 = vmatmul.mubr.bf16.vlgmr.msra.gmra.mrb[0].mxu0 %v364_v17 }
  0xf5   :  { %v342_v19 = vpop.f32.mrb[0].mxu0 }
  0xf6   :  { %v343_v20 = vpop.f32.mrb[1].mxu0 }
  0xf7   :  { %v344_v22 = vadd.f32 %v343_v20, %v342_v19  ;;  %v345_v23 = vpop.f32.mrb[2].mxu0 }
  0xf8   :  { %v346_v25 = vpop.f32.mrb[3].mxu0 }
  0xf9   :  { %v229_v26 = vadd.f32 %v344_v22, %v310_v21  ;;  %v347_v27 = vadd.f32 %v346_v25, %v345_v23 }
  0xfb   :  { %v230_v28 = vadd.f32 %v347_v27, %v310_v21  ;;  %v235_v29 = vadd.f32 %v319_v24, %v229_v26 }
  0xfd   :  { %237 = vadd.xlane.f32.xlu0 %v235_v29  ;;  %v236_v31 = vadd.f32 %v320_v30, %v230_v28 }
 0x101   :  { %239 = vadd.xlane.f32.xlu0 %v236_v31 }
 0x18a   :  { %v238_v32 = vpop.xlane.xlu0 %237 }
 0x18b   :  { %v242_v33 = vmul.f32 0.0078125, %v238_v32 }
 0x18d   :  { %v244_v34 = vsub.f32 %v235_v29, %v242_v33 }
 0x18e   :  { %v240_v35 = vpop.xlane.xlu0 %239 }
 0x18f   :  { %v243_v36 = vmul.f32 0.0078125, %v240_v35  ;;  %v246_v37 = vmul.f32 %v244_v34, %v244_v34 }
 0x191   :  { %v245_v38 = vsub.f32 %v236_v31, %v243_v36  ;;  %248 = vadd.xlane.f32.xlu1 %v246_v37 }
 0x193   :  { %v247_v39 = vmul.f32 %v245_v38, %v245_v38 }
 0x195   :  { %250 = vadd.xlane.f32.xlu1 %v247_v39 }
 0x21e   :  { %v249_v40 = vpop.xlane.xlu1 %248 }
 0x21f   :  { %v252_v41 = vmul.f32 0.0078125, %v249_v40 }
 0x221   :  { %v254_v42 = vadd.f32 1e-12, %v252_v41 }
 0x222   :  { %v251_v43 = vpop.xlane.xlu1 %250 }
 0x223   :  { %367 = vrsqrt.f32 %v254_v42  ;;  %v253_v44 = vmul.f32 0.0078125, %v251_v43 }
 0x225   :  { %v255_v45 = vadd.f32 1e-12, %v253_v44 }
 0x227   :  { %369 = vrsqrt.f32 %v255_v45 }
 0x22d   :  { %v368_v46 = vpop.eup %367 }
 0x22e   :  { %v258_v47 = vmul.f32 %v368_v46, %v244_v34 }
 0x230   :  { %v267_v50 = vmul.f32 %v311_v48, %v258_v47 }
 0x231   :  { %v370_v49 = vpop.eup %369 }
 0x232   :  { %v259_v51 = vmul.f32 %v370_v49, %v245_v38  ;;  %v276_v54 = vadd.f32 %v312_v52, %v267_v50 }
 0x234   :  { %v268_v53 = vmul.f32 %v311_v48, %v259_v51 }
 0x236   :  { %v277_v55 = vadd.f32 %v312_v52, %v268_v53 }
 0x238   :  { %v324_v56 = vpack.c.bf16 %v277_v55, %v276_v54 }
 0x23a   :  { %325 = vst [vmem:[%s481_s6] sm:$0xff] %v324_v56  }

</bundles_post_ra>
